<compile_context>
chip_gen: v7x
topology: tpu7x:2x2x1
jax: 0.10.0
libtpu: 0.0.40
codegen_flags: <defaults>
</compile_context>

<pallas_src>
import functools

import jax
import jax.numpy as jnp
from jax.experimental import pallas as pl
from jax.experimental.pallas import tpu as pltpu


def _resnet_block_kernel(x_ref, w1_ref, b1_ref, w2_ref, b2_ref, o_ref, p_ref,
                         *, nb, C, H, W, slope):
    """Fused ResnetBlock for `nb` images.

    x_ref : (nb*C, H*W)   NCHW input, spatial flattened on lanes (also identity)
    w1_ref: (C, 9*C)      conv1 weights, [co, tap*C + ci]
    b1_ref: (C, 1)        conv1 bias
    w2_ref: (C, 9*C)      conv2 weights
    b2_ref: (C, 1)        conv2 bias
    o_ref : (nb*C, H*W)   output
    p_ref : (9*C, H*W)    VMEM scratch: im2col patch matrix (reused by both convs)
    """
    HW = H * W

    # --- boundary masks (hoisted; depend only on the flat lane index) --------
    lane = jax.lax.broadcasted_iota(jnp.int32, (C, HW), 1)
    if (W & (W - 1)) == 0:                      # power-of-two fast path
        col = jnp.bitwise_and(lane, W - 1)
    else:
        col = lane % W
    up_ok = lane >= W                    # row h-1 exists
    down_ok = lane < (H - 1) * W         # row h+1 exists
    left_ok = col >= 1                   # col w-1 exists
    right_ok = col <= W - 2              # col w+1 exists

    taps = [(dh, dw) for dh in (-1, 0, 1) for dw in (-1, 0, 1)]
    tap_masks = []
    for dh, dw in taps:
        mask = None
        for m in ([up_ok] if dh == -1 else []) + \
                 ([down_ok] if dh == 1 else []) + \
                 ([left_ok] if dw == -1 else []) + \
                 ([right_ok] if dw == 1 else []):
            mask = m if mask is None else jnp.logical_and(mask, m)
        tap_masks.append(mask)

    w1 = w1_ref[...]
    w2 = w2_ref[...]
    b1 = b1_ref[...]
    b2 = b2_ref[...]

    def conv3x3_lrelu(src, wmat, bias):
        # src: (C, HW) f32  ->  (C, HW) f32, one K=9*C matmul via im2col scratch.
        for t, (dh, dw) in enumerate(taps):
            shift = (-(dh * W + dw)) % HW        # rolled[p] = src[p + dh*W + dw]
            shifted = src if shift == 0 else pltpu.roll(src, shift, axis=1)
            if tap_masks[t] is not None:
                shifted = jnp.where(tap_masks[t], shifted, 0.0)
            p_ref[t * C:(t + 1) * C, :] = shifted
        acc = jnp.dot(wmat, p_ref[...], preferred_element_type=jnp.float32)
        acc = acc + bias
        return jnp.where(acc > 0, acc, slope * acc)          # LeakyReLU(0.1)

    for n in range(nb):                       # small, statically unrolled
        x2d = x_ref[n * C:(n + 1) * C, :].astype(jnp.float32)
        h1 = conv3x3_lrelu(x2d, w1, b1)       # conv1 + relu   (stays in VMEM)
        h2 = conv3x3_lrelu(h1, w2, b2)        # conv2 + relu2
        o_ref[n * C:(n + 1) * C, :] = (h2 + x2d).astype(o_ref.dtype)


@jax.jit
def resnet_block_forward(x_nchw, params):
    """ResnetBlock.forward (stride=1, padding=1, downSample=False). NCHW in/out."""
    N, Cin, H, W = x_nchw.shape
    w1, b1, w2, b2 = params["w1"], params["b1"], params["w2"], params["b2"]
    Cout = w1.shape[-1]
    assert Cin == Cout, "downSample=False path requires input_dim == output_dim"
    HW = H * W

    # Weights (3,3,Cin,Cout) -> (Cout, 9*Cin) so the conv is one channels-first
    # matmul with H*W on the lane axis.  Tiny one-time reshapes.
    w1mat = jnp.transpose(w1.reshape(9, Cin, Cout), (2, 0, 1)).reshape(Cout, 9 * Cin)
    w2mat = jnp.transpose(w2.reshape(9, Cout, Cout), (2, 0, 1)).reshape(Cout, 9 * Cout)
    b1c = b1.reshape(Cout, 1).astype(jnp.float32)
    b2c = b2.reshape(Cout, 1).astype(jnp.float32)

    # Free row-major reshape: NCHW -> (N*C, H*W); no transpose, no pad.
    x2d = x_nchw.reshape(N * Cin, HW)

    nb = N  # whole batch in one grid step (tiny shapes); grid kept for generality
    kern = functools.partial(_resnet_block_kernel,
                             nb=nb, C=Cin, H=H, W=W, slope=0.1)
    out2d = pl.pallas_call(
        kern,
        out_shape=jax.ShapeDtypeStruct((N * Cout, HW), x_nchw.dtype),
        grid_spec=pltpu.PrefetchScalarGridSpec(
            num_scalar_prefetch=0,
            grid=(N // nb,),
            in_specs=[
                pl.BlockSpec((nb * Cin, HW), lambda i: (i, 0)),
                pl.BlockSpec((Cout, 9 * Cin), lambda i: (0, 0)),
                pl.BlockSpec((Cout, 1), lambda i: (0, 0)),
                pl.BlockSpec((Cout, 9 * Cout), lambda i: (0, 0)),
                pl.BlockSpec((Cout, 1), lambda i: (0, 0)),
            ],
            out_specs=pl.BlockSpec((nb * Cout, HW), lambda i: (i, 0)),
            scratch_shapes=[pltpu.VMEM((9 * Cin, HW), jnp.float32)],
        ),
        compiler_params=pltpu.CompilerParams(
            dimension_semantics=("parallel",)),
    )(x2d, w1mat, b1c, w2mat, b2c)

    return out2d.reshape(N, Cout, H, W)


def init_resnet_block_params(key, input_dim, output_dim, kernel_size=3):
    """PyTorch Conv2d-style init (uniform +-1/sqrt(fan_in)); weights stored HWIO."""
    k1, k2, k3, k4 = jax.random.split(key, 4)
    fan1 = input_dim * kernel_size * kernel_size
    fan2 = output_dim * kernel_size * kernel_size
    l1 = 1.0 / jnp.sqrt(fan1)
    l2 = 1.0 / jnp.sqrt(fan2)
    w1 = jax.random.uniform(k1, (kernel_size, kernel_size, input_dim, output_dim),
                            jnp.float32, -l1, l1)
    b1 = jax.random.uniform(k2, (output_dim,), jnp.float32, -l1, l1)
    w2 = jax.random.uniform(k3, (kernel_size, kernel_size, output_dim, output_dim),
                            jnp.float32, -l2, l2)
    b2 = jax.random.uniform(k4, (output_dim,), jnp.float32, -l2, l2)
    return {"w1": w1, "b1": b1, "w2": w2, "b2": b2}


def _reference_forward(x_nchw, params):
    """Pure-JAX reference for validation."""
    dn = ("NHWC", "HWIO", "NHWC")
    x = jnp.transpose(x_nchw, (0, 2, 3, 1))
    h = jax.lax.conv_general_dilated(x, params["w1"], (1, 1), "SAME",
                                     dimension_numbers=dn) + params["b1"]
    h = jnp.where(h > 0, h, 0.1 * h)
    o = jax.lax.conv_general_dilated(h, params["w2"], (1, 1), "SAME",
                                     dimension_numbers=dn) + params["b2"]
    o = jnp.where(o > 0, o, 0.1 * o)
    o = o + x
    return jnp.transpose(o, (0, 3, 1, 2))


if __name__ == "__main__":
    key = jax.random.PRNGKey(0)
    kx, kp = jax.random.split(key)

    N, C, H, W = 2, 4, 16, 16            # input_dim == output_dim (no downSample)
    x = jax.random.normal(kx, (N, C, H, W), jnp.float32)
    params = init_resnet_block_params(kp, input_dim=C, output_dim=C)

    out = jax.block_until_ready(resnet_block_forward(x, params))

    ref = _reference_forward(x, params)
    assert out.shape == (N, C, H, W)
    assert jnp.allclose(out, ref, atol=1e-4, rtol=1e-4), "mismatch vs reference"

    print("KERNEL_OK")
</pallas_src>

<mosaic_0001>
module attributes {stable_mosaic.version = 11 : i64} {
  func.func @_resnet_block_kernel(%arg0: i32, %arg1: memref<8x256xf32, #tpu.memory_space<vmem>>, %arg2: memref<4x36xf32, #tpu.memory_space<vmem>>, %arg3: memref<4x1xf32, #tpu.memory_space<vmem>>, %arg4: memref<4x36xf32, #tpu.memory_space<vmem>>, %arg5: memref<4x1xf32, #tpu.memory_space<vmem>>, %arg6: memref<8x256xf32, #tpu.memory_space<vmem>>, %arg7: memref<36x256xf32, #tpu.memory_space<vmem>>) attributes {dimension_semantics = [#tpu.dimension_semantics<parallel>], iteration_bounds = array<i64: 1>, scalar_prefetch = 0 : i64, scratch_operands = 1 : i64, tpu.core_type = #tpu.core_type<tc>, window_params = [{transform_indices = @transform_0, window_bounds = array<i64: 8, 256>}, {pipeline_mode = #tpu.pipeline_mode<synchronous>, transform_indices = @transform_1, window_bounds = array<i64: 4, 36>}, {pipeline_mode = #tpu.pipeline_mode<synchronous>, transform_indices = @transform_2, window_bounds = array<i64: 4, 1>}, {pipeline_mode = #tpu.pipeline_mode<synchronous>, transform_indices = @transform_3, window_bounds = array<i64: 4, 36>}, {pipeline_mode = #tpu.pipeline_mode<synchronous>, transform_indices = @transform_4, window_bounds = array<i64: 4, 1>}, {transform_indices = @transform_5, window_bounds = array<i64: 8, 256>}]} {
    %0 = tpu.iota {dimensions = array<i32: 1>} : vector<4x256xi32>
    %c15_i32 = arith.constant 15 : i32
    %1 = vector.broadcast %c15_i32 : i32 to vector<4x256xi32>
    %2 = arith.andi %0, %1 : vector<4x256xi32>
    %c16_i32 = arith.constant 16 : i32
    %3 = vector.broadcast %c16_i32 : i32 to vector<4x256xi32>
    %4 = arith.cmpi sge, %0, %3 : vector<4x256xi32>
    %c240_i32 = arith.constant 240 : i32
    %5 = vector.broadcast %c240_i32 : i32 to vector<4x256xi32>
    %6 = arith.cmpi slt, %0, %5 : vector<4x256xi32>
    %c1_i32 = arith.constant 1 : i32
    %7 = vector.broadcast %c1_i32 : i32 to vector<4x256xi32>
    %8 = arith.cmpi sge, %2, %7 : vector<4x256xi32>
    %c14_i32 = arith.constant 14 : i32
    %9 = vector.broadcast %c14_i32 : i32 to vector<4x256xi32>
    %10 = arith.cmpi sle, %2, %9 : vector<4x256xi32>
    %11 = arith.andi %4, %8 : vector<4x256xi1>
    %12 = arith.andi %4, %10 : vector<4x256xi1>
    %13 = arith.andi %6, %8 : vector<4x256xi1>
    %14 = arith.andi %6, %10 : vector<4x256xi1>
    %c0 = arith.constant 0 : index
    %c0_0 = arith.constant 0 : index
    %15 = vector.load %arg2[%c0, %c0_0] : memref<4x36xf32, #tpu.memory_space<vmem>>, vector<4x36xf32>
    %c0_1 = arith.constant 0 : index
    %c0_2 = arith.constant 0 : index
    %16 = vector.load %arg4[%c0_1, %c0_2] : memref<4x36xf32, #tpu.memory_space<vmem>>, vector<4x36xf32>
    %c0_3 = arith.constant 0 : index
    %c0_4 = arith.constant 0 : index
    %17 = vector.load %arg3[%c0_3, %c0_4] : memref<4x1xf32, #tpu.memory_space<vmem>>, vector<4x1xf32>
    %c0_5 = arith.constant 0 : index
    %c0_6 = arith.constant 0 : index
    %18 = vector.load %arg5[%c0_5, %c0_6] : memref<4x1xf32, #tpu.memory_space<vmem>>, vector<4x1xf32>
    %c0_7 = arith.constant 0 : index
    %c0_8 = arith.constant 0 : index
    %19 = vector.load %arg1[%c0_7, %c0_8] : memref<8x256xf32, #tpu.memory_space<vmem>>, vector<4x256xf32>
    %c17_i32 = arith.constant 17 : i32
    %20 = tpu.dynamic_rotate %19 by %c17_i32 dim 1 : vector<4x256xf32>, i32 -> vector<4x256xf32>
    %cst = arith.constant 0.000000e+00 : f32
    %21 = vector.broadcast %cst : f32 to vector<4x256xf32>
    %22 = arith.select %11, %20, %21 : vector<4x256xi1>, vector<4x256xf32>
    %c0_9 = arith.constant 0 : index
    %c0_10 = arith.constant 0 : index
    %23 = vector.load %arg7[%c0_9, %c0_10] : memref<36x256xf32, #tpu.memory_space<vmem>>, vector<4x256xf32>
    tpu.vector_store %arg7[%c0_9, %c0_10], %22 {strides = array<i32>} : memref<36x256xf32, #tpu.memory_space<vmem>>, vector<4x256xf32>,
    %c16_i32_11 = arith.constant 16 : i32
    %24 = tpu.dynamic_rotate %19 by %c16_i32_11 dim 1 : vector<4x256xf32>, i32 -> vector<4x256xf32>
    %cst_12 = arith.constant 0.000000e+00 : f32
    %25 = vector.broadcast %cst_12 : f32 to vector<4x256xf32>
    %26 = arith.select %4, %24, %25 : vector<4x256xi1>, vector<4x256xf32>
    %c4 = arith.constant 4 : index
    %c0_13 = arith.constant 0 : index
    %27 = vector.load %arg7[%c4, %c0_13] : memref<36x256xf32, #tpu.memory_space<vmem>>, vector<4x256xf32>
    tpu.vector_store %arg7[%c4, %c0_13], %26 {strides = array<i32>} : memref<36x256xf32, #tpu.memory_space<vmem>>, vector<4x256xf32>,
    %c15_i32_14 = arith.constant 15 : i32
    %28 = tpu.dynamic_rotate %19 by %c15_i32_14 dim 1 : vector<4x256xf32>, i32 -> vector<4x256xf32>
    %cst_15 = arith.constant 0.000000e+00 : f32
    %29 = vector.broadcast %cst_15 : f32 to vector<4x256xf32>
    %30 = arith.select %12, %28, %29 : vector<4x256xi1>, vector<4x256xf32>
    %c8 = arith.constant 8 : index
    %c0_16 = arith.constant 0 : index
    %31 = vector.load %arg7[%c8, %c0_16] : memref<36x256xf32, #tpu.memory_space<vmem>>, vector<4x256xf32>
    tpu.vector_store %arg7[%c8, %c0_16], %30 {strides = array<i32>} : memref<36x256xf32, #tpu.memory_space<vmem>>, vector<4x256xf32>,
    %c1_i32_17 = arith.constant 1 : i32
    %32 = tpu.dynamic_rotate %19 by %c1_i32_17 dim 1 : vector<4x256xf32>, i32 -> vector<4x256xf32>
    %cst_18 = arith.constant 0.000000e+00 : f32
    %33 = vector.broadcast %cst_18 : f32 to vector<4x256xf32>
    %34 = arith.select %8, %32, %33 : vector<4x256xi1>, vector<4x256xf32>
    %c12 = arith.constant 12 : index
    %c0_19 = arith.constant 0 : index
    %35 = vector.load %arg7[%c12, %c0_19] : memref<36x256xf32, #tpu.memory_space<vmem>>, vector<4x256xf32>
    tpu.vector_store %arg7[%c12, %c0_19], %34 {strides = array<i32>} : memref<36x256xf32, #tpu.memory_space<vmem>>, vector<4x256xf32>,
    %c16 = arith.constant 16 : index
    %c0_20 = arith.constant 0 : index
    %36 = vector.load %arg7[%c16, %c0_20] : memref<36x256xf32, #tpu.memory_space<vmem>>, vector<4x256xf32>
    tpu.vector_store %arg7[%c16, %c0_20], %19 {strides = array<i32>} : memref<36x256xf32, #tpu.memory_space<vmem>>, vector<4x256xf32>,
    %c255_i32 = arith.constant 255 : i32
    %37 = tpu.dynamic_rotate %19 by %c255_i32 dim 1 : vector<4x256xf32>, i32 -> vector<4x256xf32>
    %cst_21 = arith.constant 0.000000e+00 : f32
    %38 = vector.broadcast %cst_21 : f32 to vector<4x256xf32>
    %39 = arith.select %10, %37, %38 : vector<4x256xi1>, vector<4x256xf32>
    %c20 = arith.constant 20 : index
    %c0_22 = arith.constant 0 : index
    %40 = vector.load %arg7[%c20, %c0_22] : memref<36x256xf32, #tpu.memory_space<vmem>>, vector<4x256xf32>
    tpu.vector_store %arg7[%c20, %c0_22], %39 {strides = array<i32>} : memref<36x256xf32, #tpu.memory_space<vmem>>, vector<4x256xf32>,
    %c241_i32 = arith.constant 241 : i32
    %41 = tpu.dynamic_rotate %19 by %c241_i32 dim 1 : vector<4x256xf32>, i32 -> vector<4x256xf32>
    %cst_23 = arith.constant 0.000000e+00 : f32
    %42 = vector.broadcast %cst_23 : f32 to vector<4x256xf32>
    %43 = arith.select %13, %41, %42 : vector<4x256xi1>, vector<4x256xf32>
    %c24 = arith.constant 24 : index
    %c0_24 = arith.constant 0 : index
    %44 = vector.load %arg7[%c24, %c0_24] : memref<36x256xf32, #tpu.memory_space<vmem>>, vector<4x256xf32>
    tpu.vector_store %arg7[%c24, %c0_24], %43 {strides = array<i32>} : memref<36x256xf32, #tpu.memory_space<vmem>>, vector<4x256xf32>,
    %c240_i32_25 = arith.constant 240 : i32
    %45 = tpu.dynamic_rotate %19 by %c240_i32_25 dim 1 : vector<4x256xf32>, i32 -> vector<4x256xf32>
    %cst_26 = arith.constant 0.000000e+00 : f32
    %46 = vector.broadcast %cst_26 : f32 to vector<4x256xf32>
    %47 = arith.select %6, %45, %46 : vector<4x256xi1>, vector<4x256xf32>
    %c28 = arith.constant 28 : index
    %c0_27 = arith.constant 0 : index
    %48 = vector.load %arg7[%c28, %c0_27] : memref<36x256xf32, #tpu.memory_space<vmem>>, vector<4x256xf32>
    tpu.vector_store %arg7[%c28, %c0_27], %47 {strides = array<i32>} : memref<36x256xf32, #tpu.memory_space<vmem>>, vector<4x256xf32>,
    %c239_i32 = arith.constant 239 : i32
    %49 = tpu.dynamic_rotate %19 by %c239_i32 dim 1 : vector<4x256xf32>, i32 -> vector<4x256xf32>
    %cst_28 = arith.constant 0.000000e+00 : f32
    %50 = vector.broadcast %cst_28 : f32 to vector<4x256xf32>
    %51 = arith.select %14, %49, %50 : vector<4x256xi1>, vector<4x256xf32>
    %c32 = arith.constant 32 : index
    %c0_29 = arith.constant 0 : index
    %52 = vector.load %arg7[%c32, %c0_29] : memref<36x256xf32, #tpu.memory_space<vmem>>, vector<4x256xf32>
    tpu.vector_store %arg7[%c32, %c0_29], %51 {strides = array<i32>} : memref<36x256xf32, #tpu.memory_space<vmem>>, vector<4x256xf32>,
    %c0_30 = arith.constant 0 : index
    %c0_31 = arith.constant 0 : index
    %53 = vector.load %arg7[%c0_30, %c0_31] : memref<36x256xf32, #tpu.memory_space<vmem>>, vector<36x256xf32>
    %cst_32 = arith.constant dense<0.000000e+00> : vector<4x256xf32>
    %54 = tpu.matmul %15, %53, %cst_32 {dimension_numbers = #tpu.dot_dimension_numbers<[1], [0], [0], [1], [0, 0, 1, 1], [], []>} : vector<4x36xf32>, vector<36x256xf32>, vector<4x256xf32> -> vector<4x256xf32>
    %55 = vector.broadcast %17 : vector<4x1xf32> to vector<4x256xf32>
    %56 = arith.addf %54, %55 : vector<4x256xf32>
    %cst_33 = arith.constant 0.000000e+00 : f32
    %57 = vector.broadcast %cst_33 : f32 to vector<4x256xf32>
    %58 = arith.cmpf ogt, %56, %57 : vector<4x256xf32>
    %cst_34 = arith.constant 1.000000e-01 : f32
    %59 = vector.broadcast %cst_34 : f32 to vector<4x256xf32>
    %60 = arith.mulf %59, %56 : vector<4x256xf32>
    %61 = arith.select %58, %56, %60 : vector<4x256xi1>, vector<4x256xf32>
    %c17_i32_35 = arith.constant 17 : i32
    %62 = tpu.dynamic_rotate %61 by %c17_i32_35 dim 1 : vector<4x256xf32>, i32 -> vector<4x256xf32>
    %cst_36 = arith.constant 0.000000e+00 : f32
    %63 = vector.broadcast %cst_36 : f32 to vector<4x256xf32>
    %64 = arith.select %11, %62, %63 : vector<4x256xi1>, vector<4x256xf32>
    %c0_37 = arith.constant 0 : index
    %c0_38 = arith.constant 0 : index
    %65 = vector.load %arg7[%c0_37, %c0_38] : memref<36x256xf32, #tpu.memory_space<vmem>>, vector<4x256xf32>
    tpu.vector_store %arg7[%c0_37, %c0_38], %64 {strides = array<i32>} : memref<36x256xf32, #tpu.memory_space<vmem>>, vector<4x256xf32>,
    %c16_i32_39 = arith.constant 16 : i32
    %66 = tpu.dynamic_rotate %61 by %c16_i32_39 dim 1 : vector<4x256xf32>, i32 -> vector<4x256xf32>
    %cst_40 = arith.constant 0.000000e+00 : f32
    %67 = vector.broadcast %cst_40 : f32 to vector<4x256xf32>
    %68 = arith.select %4, %66, %67 : vector<4x256xi1>, vector<4x256xf32>
    %c4_41 = arith.constant 4 : index
    %c0_42 = arith.constant 0 : index
    %69 = vector.load %arg7[%c4_41, %c0_42] : memref<36x256xf32, #tpu.memory_space<vmem>>, vector<4x256xf32>
    tpu.vector_store %arg7[%c4_41, %c0_42], %68 {strides = array<i32>} : memref<36x256xf32, #tpu.memory_space<vmem>>, vector<4x256xf32>,
    %c15_i32_43 = arith.constant 15 : i32
    %70 = tpu.dynamic_rotate %61 by %c15_i32_43 dim 1 : vector<4x256xf32>, i32 -> vector<4x256xf32>
    %cst_44 = arith.constant 0.000000e+00 : f32
    %71 = vector.broadcast %cst_44 : f32 to vector<4x256xf32>
    %72 = arith.select %12, %70, %71 : vector<4x256xi1>, vector<4x256xf32>
    %c8_45 = arith.constant 8 : index
    %c0_46 = arith.constant 0 : index
    %73 = vector.load %arg7[%c8_45, %c0_46] : memref<36x256xf32, #tpu.memory_space<vmem>>, vector<4x256xf32>
    tpu.vector_store %arg7[%c8_45, %c0_46], %72 {strides = array<i32>} : memref<36x256xf32, #tpu.memory_space<vmem>>, vector<4x256xf32>,
    %c1_i32_47 = arith.constant 1 : i32
    %74 = tpu.dynamic_rotate %61 by %c1_i32_47 dim 1 : vector<4x256xf32>, i32 -> vector<4x256xf32>
    %cst_48 = arith.constant 0.000000e+00 : f32
    %75 = vector.broadcast %cst_48 : f32 to vector<4x256xf32>
    %76 = arith.select %8, %74, %75 : vector<4x256xi1>, vector<4x256xf32>
    %c12_49 = arith.constant 12 : index
    %c0_50 = arith.constant 0 : index
    %77 = vector.load %arg7[%c12_49, %c0_50] : memref<36x256xf32, #tpu.memory_space<vmem>>, vector<4x256xf32>
    tpu.vector_store %arg7[%c12_49, %c0_50], %76 {strides = array<i32>} : memref<36x256xf32, #tpu.memory_space<vmem>>, vector<4x256xf32>,
    %c16_51 = arith.constant 16 : index
    %c0_52 = arith.constant 0 : index
    %78 = vector.load %arg7[%c16_51, %c0_52] : memref<36x256xf32, #tpu.memory_space<vmem>>, vector<4x256xf32>
    tpu.vector_store %arg7[%c16_51, %c0_52], %61 {strides = array<i32>} : memref<36x256xf32, #tpu.memory_space<vmem>>, vector<4x256xf32>,
    %c255_i32_53 = arith.constant 255 : i32
    %79 = tpu.dynamic_rotate %61 by %c255_i32_53 dim 1 : vector<4x256xf32>, i32 -> vector<4x256xf32>
    %cst_54 = arith.constant 0.000000e+00 : f32
    %80 = vector.broadcast %cst_54 : f32 to vector<4x256xf32>
    %81 = arith.select %10, %79, %80 : vector<4x256xi1>, vector<4x256xf32>
    %c20_55 = arith.constant 20 : index
    %c0_56 = arith.constant 0 : index
    %82 = vector.load %arg7[%c20_55, %c0_56] : memref<36x256xf32, #tpu.memory_space<vmem>>, vector<4x256xf32>
    tpu.vector_store %arg7[%c20_55, %c0_56], %81 {strides = array<i32>} : memref<36x256xf32, #tpu.memory_space<vmem>>, vector<4x256xf32>,
    %c241_i32_57 = arith.constant 241 : i32
    %83 = tpu.dynamic_rotate %61 by %c241_i32_57 dim 1 : vector<4x256xf32>, i32 -> vector<4x256xf32>
    %cst_58 = arith.constant 0.000000e+00 : f32
    %84 = vector.broadcast %cst_58 : f32 to vector<4x256xf32>
    %85 = arith.select %13, %83, %84 : vector<4x256xi1>, vector<4x256xf32>
    %c24_59 = arith.constant 24 : index
    %c0_60 = arith.constant 0 : index
    %86 = vector.load %arg7[%c24_59, %c0_60] : memref<36x256xf32, #tpu.memory_space<vmem>>, vector<4x256xf32>
    tpu.vector_store %arg7[%c24_59, %c0_60], %85 {strides = array<i32>} : memref<36x256xf32, #tpu.memory_space<vmem>>, vector<4x256xf32>,
    %c240_i32_61 = arith.constant 240 : i32
    %87 = tpu.dynamic_rotate %61 by %c240_i32_61 dim 1 : vector<4x256xf32>, i32 -> vector<4x256xf32>
    %cst_62 = arith.constant 0.000000e+00 : f32
    %88 = vector.broadcast %cst_62 : f32 to vector<4x256xf32>
    %89 = arith.select %6, %87, %88 : vector<4x256xi1>, vector<4x256xf32>
    %c28_63 = arith.constant 28 : index
    %c0_64 = arith.constant 0 : index
    %90 = vector.load %arg7[%c28_63, %c0_64] : memref<36x256xf32, #tpu.memory_space<vmem>>, vector<4x256xf32>
    tpu.vector_store %arg7[%c28_63, %c0_64], %89 {strides = array<i32>} : memref<36x256xf32, #tpu.memory_space<vmem>>, vector<4x256xf32>,
    %c239_i32_65 = arith.constant 239 : i32
    %91 = tpu.dynamic_rotate %61 by %c239_i32_65 dim 1 : vector<4x256xf32>, i32 -> vector<4x256xf32>
    %cst_66 = arith.constant 0.000000e+00 : f32
    %92 = vector.broadcast %cst_66 : f32 to vector<4x256xf32>
    %93 = arith.select %14, %91, %92 : vector<4x256xi1>, vector<4x256xf32>
    %c32_67 = arith.constant 32 : index
    %c0_68 = arith.constant 0 : index
    %94 = vector.load %arg7[%c32_67, %c0_68] : memref<36x256xf32, #tpu.memory_space<vmem>>, vector<4x256xf32>
    tpu.vector_store %arg7[%c32_67, %c0_68], %93 {strides = array<i32>} : memref<36x256xf32, #tpu.memory_space<vmem>>, vector<4x256xf32>,
    %c0_69 = arith.constant 0 : index
    %c0_70 = arith.constant 0 : index
    %95 = vector.load %arg7[%c0_69, %c0_70] : memref<36x256xf32, #tpu.memory_space<vmem>>, vector<36x256xf32>
    %cst_71 = arith.constant dense<0.000000e+00> : vector<4x256xf32>
    %96 = tpu.matmul %16, %95, %cst_71 {dimension_numbers = #tpu.dot_dimension_numbers<[1], [0], [0], [1], [0, 0, 1, 1], [], []>} : vector<4x36xf32>, vector<36x256xf32>, vector<4x256xf32> -> vector<4x256xf32>
    %97 = vector.broadcast %18 : vector<4x1xf32> to vector<4x256xf32>
    %98 = arith.addf %96, %97 : vector<4x256xf32>
    %cst_72 = arith.constant 0.000000e+00 : f32
    %99 = vector.broadcast %cst_72 : f32 to vector<4x256xf32>
    %100 = arith.cmpf ogt, %98, %99 : vector<4x256xf32>
    %cst_73 = arith.constant 1.000000e-01 : f32
    %101 = vector.broadcast %cst_73 : f32 to vector<4x256xf32>
    %102 = arith.mulf %101, %98 : vector<4x256xf32>
    %103 = arith.select %100, %98, %102 : vector<4x256xi1>, vector<4x256xf32>
    %104 = arith.addf %103, %19 : vector<4x256xf32>
    %c0_74 = arith.constant 0 : index
    %c0_75 = arith.constant 0 : index
    %105 = vector.load %arg6[%c0_74, %c0_75] : memref<8x256xf32, #tpu.memory_space<vmem>>, vector<4x256xf32>
    tpu.vector_store %arg6[%c0_74, %c0_75], %104 {strides = array<i32>} : memref<8x256xf32, #tpu.memory_space<vmem>>, vector<4x256xf32>,
    %c4_76 = arith.constant 4 : index
    %c0_77 = arith.constant 0 : index
    %106 = vector.load %arg1[%c4_76, %c0_77] : memref<8x256xf32, #tpu.memory_space<vmem>>, vector<4x256xf32>
    %c17_i32_78 = arith.constant 17 : i32
    %107 = tpu.dynamic_rotate %106 by %c17_i32_78 dim 1 : vector<4x256xf32>, i32 -> vector<4x256xf32>
    %cst_79 = arith.constant 0.000000e+00 : f32
    %108 = vector.broadcast %cst_79 : f32 to vector<4x256xf32>
    %109 = arith.select %11, %107, %108 : vector<4x256xi1>, vector<4x256xf32>
    %c0_80 = arith.constant 0 : index
    %c0_81 = arith.constant 0 : index
    %110 = vector.load %arg7[%c0_80, %c0_81] : memref<36x256xf32, #tpu.memory_space<vmem>>, vector<4x256xf32>
    tpu.vector_store %arg7[%c0_80, %c0_81], %109 {strides = array<i32>} : memref<36x256xf32, #tpu.memory_space<vmem>>, vector<4x256xf32>,
    %c16_i32_82 = arith.constant 16 : i32
    %111 = tpu.dynamic_rotate %106 by %c16_i32_82 dim 1 : vector<4x256xf32>, i32 -> vector<4x256xf32>
    %cst_83 = arith.constant 0.000000e+00 : f32
    %112 = vector.broadcast %cst_83 : f32 to vector<4x256xf32>
    %113 = arith.select %4, %111, %112 : vector<4x256xi1>, vector<4x256xf32>
    %c4_84 = arith.constant 4 : index
    %c0_85 = arith.constant 0 : index
    %114 = vector.load %arg7[%c4_84, %c0_85] : memref<36x256xf32, #tpu.memory_space<vmem>>, vector<4x256xf32>
    tpu.vector_store %arg7[%c4_84, %c0_85], %113 {strides = array<i32>} : memref<36x256xf32, #tpu.memory_space<vmem>>, vector<4x256xf32>,
    %c15_i32_86 = arith.constant 15 : i32
    %115 = tpu.dynamic_rotate %106 by %c15_i32_86 dim 1 : vector<4x256xf32>, i32 -> vector<4x256xf32>
    %cst_87 = arith.constant 0.000000e+00 : f32
    %116 = vector.broadcast %cst_87 : f32 to vector<4x256xf32>
    %117 = arith.select %12, %115, %116 : vector<4x256xi1>, vector<4x256xf32>
    %c8_88 = arith.constant 8 : index
    %c0_89 = arith.constant 0 : index
    %118 = vector.load %arg7[%c8_88, %c0_89] : memref<36x256xf32, #tpu.memory_space<vmem>>, vector<4x256xf32>
    tpu.vector_store %arg7[%c8_88, %c0_89], %117 {strides = array<i32>} : memref<36x256xf32, #tpu.memory_space<vmem>>, vector<4x256xf32>,
    %c1_i32_90 = arith.constant 1 : i32
    %119 = tpu.dynamic_rotate %106 by %c1_i32_90 dim 1 : vector<4x256xf32>, i32 -> vector<4x256xf32>
    %cst_91 = arith.constant 0.000000e+00 : f32
    %120 = vector.broadcast %cst_91 : f32 to vector<4x256xf32>
    %121 = arith.select %8, %119, %120 : vector<4x256xi1>, vector<4x256xf32>
    %c12_92 = arith.constant 12 : index
    %c0_93 = arith.constant 0 : index
    %122 = vector.load %arg7[%c12_92, %c0_93] : memref<36x256xf32, #tpu.memory_space<vmem>>, vector<4x256xf32>
    tpu.vector_store %arg7[%c12_92, %c0_93], %121 {strides = array<i32>} : memref<36x256xf32, #tpu.memory_space<vmem>>, vector<4x256xf32>,
    %c16_94 = arith.constant 16 : index
    %c0_95 = arith.constant 0 : index
    %123 = vector.load %arg7[%c16_94, %c0_95] : memref<36x256xf32, #tpu.memory_space<vmem>>, vector<4x256xf32>
    tpu.vector_store %arg7[%c16_94, %c0_95], %106 {strides = array<i32>} : memref<36x256xf32, #tpu.memory_space<vmem>>, vector<4x256xf32>,
    %c255_i32_96 = arith.constant 255 : i32
    %124 = tpu.dynamic_rotate %106 by %c255_i32_96 dim 1 : vector<4x256xf32>, i32 -> vector<4x256xf32>
    %cst_97 = arith.constant 0.000000e+00 : f32
    %125 = vector.broadcast %cst_97 : f32 to vector<4x256xf32>
    %126 = arith.select %10, %124, %125 : vector<4x256xi1>, vector<4x256xf32>
    %c20_98 = arith.constant 20 : index
    %c0_99 = arith.constant 0 : index
    %127 = vector.load %arg7[%c20_98, %c0_99] : memref<36x256xf32, #tpu.memory_space<vmem>>, vector<4x256xf32>
    tpu.vector_store %arg7[%c20_98, %c0_99], %126 {strides = array<i32>} : memref<36x256xf32, #tpu.memory_space<vmem>>, vector<4x256xf32>,
    %c241_i32_100 = arith.constant 241 : i32
    %128 = tpu.dynamic_rotate %106 by %c241_i32_100 dim 1 : vector<4x256xf32>, i32 -> vector<4x256xf32>
    %cst_101 = arith.constant 0.000000e+00 : f32
    %129 = vector.broadcast %cst_101 : f32 to vector<4x256xf32>
    %130 = arith.select %13, %128, %129 : vector<4x256xi1>, vector<4x256xf32>
    %c24_102 = arith.constant 24 : index
    %c0_103 = arith.constant 0 : index
    %131 = vector.load %arg7[%c24_102, %c0_103] : memref<36x256xf32, #tpu.memory_space<vmem>>, vector<4x256xf32>
    tpu.vector_store %arg7[%c24_102, %c0_103], %130 {strides = array<i32>} : memref<36x256xf32, #tpu.memory_space<vmem>>, vector<4x256xf32>,
    %c240_i32_104 = arith.constant 240 : i32
    %132 = tpu.dynamic_rotate %106 by %c240_i32_104 dim 1 : vector<4x256xf32>, i32 -> vector<4x256xf32>
    %cst_105 = arith.constant 0.000000e+00 : f32
    %133 = vector.broadcast %cst_105 : f32 to vector<4x256xf32>
    %134 = arith.select %6, %132, %133 : vector<4x256xi1>, vector<4x256xf32>
    %c28_106 = arith.constant 28 : index
    %c0_107 = arith.constant 0 : index
    %135 = vector.load %arg7[%c28_106, %c0_107] : memref<36x256xf32, #tpu.memory_space<vmem>>, vector<4x256xf32>
    tpu.vector_store %arg7[%c28_106, %c0_107], %134 {strides = array<i32>} : memref<36x256xf32, #tpu.memory_space<vmem>>, vector<4x256xf32>,
    %c239_i32_108 = arith.constant 239 : i32
    %136 = tpu.dynamic_rotate %106 by %c239_i32_108 dim 1 : vector<4x256xf32>, i32 -> vector<4x256xf32>
    %cst_109 = arith.constant 0.000000e+00 : f32
    %137 = vector.broadcast %cst_109 : f32 to vector<4x256xf32>
    %138 = arith.select %14, %136, %137 : vector<4x256xi1>, vector<4x256xf32>
    %c32_110 = arith.constant 32 : index
    %c0_111 = arith.constant 0 : index
    %139 = vector.load %arg7[%c32_110, %c0_111] : memref<36x256xf32, #tpu.memory_space<vmem>>, vector<4x256xf32>
    tpu.vector_store %arg7[%c32_110, %c0_111], %138 {strides = array<i32>} : memref<36x256xf32, #tpu.memory_space<vmem>>, vector<4x256xf32>,
    %c0_112 = arith.constant 0 : index
    %c0_113 = arith.constant 0 : index
    %140 = vector.load %arg7[%c0_112, %c0_113] : memref<36x256xf32, #tpu.memory_space<vmem>>, vector<36x256xf32>
    %cst_114 = arith.constant dense<0.000000e+00> : vector<4x256xf32>
    %141 = tpu.matmul %15, %140, %cst_114 {dimension_numbers = #tpu.dot_dimension_numbers<[1], [0], [0], [1], [0, 0, 1, 1], [], []>} : vector<4x36xf32>, vector<36x256xf32>, vector<4x256xf32> -> vector<4x256xf32>
    %142 = vector.broadcast %17 : vector<4x1xf32> to vector<4x256xf32>
    %143 = arith.addf %141, %142 : vector<4x256xf32>
    %cst_115 = arith.constant 0.000000e+00 : f32
    %144 = vector.broadcast %cst_115 : f32 to vector<4x256xf32>
    %145 = arith.cmpf ogt, %143, %144 : vector<4x256xf32>
    %cst_116 = arith.constant 1.000000e-01 : f32
    %146 = vector.broadcast %cst_116 : f32 to vector<4x256xf32>
    %147 = arith.mulf %146, %143 : vector<4x256xf32>
    %148 = arith.select %145, %143, %147 : vector<4x256xi1>, vector<4x256xf32>
    %c17_i32_117 = arith.constant 17 : i32
    %149 = tpu.dynamic_rotate %148 by %c17_i32_117 dim 1 : vector<4x256xf32>, i32 -> vector<4x256xf32>
    %cst_118 = arith.constant 0.000000e+00 : f32
    %150 = vector.broadcast %cst_118 : f32 to vector<4x256xf32>
    %151 = arith.select %11, %149, %150 : vector<4x256xi1>, vector<4x256xf32>
    %c0_119 = arith.constant 0 : index
    %c0_120 = arith.constant 0 : index
    %152 = vector.load %arg7[%c0_119, %c0_120] : memref<36x256xf32, #tpu.memory_space<vmem>>, vector<4x256xf32>
    tpu.vector_store %arg7[%c0_119, %c0_120], %151 {strides = array<i32>} : memref<36x256xf32, #tpu.memory_space<vmem>>, vector<4x256xf32>,
    %c16_i32_121 = arith.constant 16 : i32
    %153 = tpu.dynamic_rotate %148 by %c16_i32_121 dim 1 : vector<4x256xf32>, i32 -> vector<4x256xf32>
    %cst_122 = arith.constant 0.000000e+00 : f32
    %154 = vector.broadcast %cst_122 : f32 to vector<4x256xf32>
    %155 = arith.select %4, %153, %154 : vector<4x256xi1>, vector<4x256xf32>
    %c4_123 = arith.constant 4 : index
    %c0_124 = arith.constant 0 : index
    %156 = vector.load %arg7[%c4_123, %c0_124] : memref<36x256xf32, #tpu.memory_space<vmem>>, vector<4x256xf32>
    tpu.vector_store %arg7[%c4_123, %c0_124], %155 {strides = array<i32>} : memref<36x256xf32, #tpu.memory_space<vmem>>, vector<4x256xf32>,
    %c15_i32_125 = arith.constant 15 : i32
    %157 = tpu.dynamic_rotate %148 by %c15_i32_125 dim 1 : vector<4x256xf32>, i32 -> vector<4x256xf32>
    %cst_126 = arith.constant 0.000000e+00 : f32
    %158 = vector.broadcast %cst_126 : f32 to vector<4x256xf32>
    %159 = arith.select %12, %157, %158 : vector<4x256xi1>, vector<4x256xf32>
    %c8_127 = arith.constant 8 : index
    %c0_128 = arith.constant 0 : index
    %160 = vector.load %arg7[%c8_127, %c0_128] : memref<36x256xf32, #tpu.memory_space<vmem>>, vector<4x256xf32>
    tpu.vector_store %arg7[%c8_127, %c0_128], %159 {strides = array<i32>} : memref<36x256xf32, #tpu.memory_space<vmem>>, vector<4x256xf32>,
    %c1_i32_129 = arith.constant 1 : i32
    %161 = tpu.dynamic_rotate %148 by %c1_i32_129 dim 1 : vector<4x256xf32>, i32 -> vector<4x256xf32>
    %cst_130 = arith.constant 0.000000e+00 : f32
    %162 = vector.broadcast %cst_130 : f32 to vector<4x256xf32>
    %163 = arith.select %8, %161, %162 : vector<4x256xi1>, vector<4x256xf32>
    %c12_131 = arith.constant 12 : index
    %c0_132 = arith.constant 0 : index
    %164 = vector.load %arg7[%c12_131, %c0_132] : memref<36x256xf32, #tpu.memory_space<vmem>>, vector<4x256xf32>
    tpu.vector_store %arg7[%c12_131, %c0_132], %163 {strides = array<i32>} : memref<36x256xf32, #tpu.memory_space<vmem>>, vector<4x256xf32>,
    %c16_133 = arith.constant 16 : index
    %c0_134 = arith.constant 0 : index
    %165 = vector.load %arg7[%c16_133, %c0_134] : memref<36x256xf32, #tpu.memory_space<vmem>>, vector<4x256xf32>
    tpu.vector_store %arg7[%c16_133, %c0_134], %148 {strides = array<i32>} : memref<36x256xf32, #tpu.memory_space<vmem>>, vector<4x256xf32>,
    %c255_i32_135 = arith.constant 255 : i32
    %166 = tpu.dynamic_rotate %148 by %c255_i32_135 dim 1 : vector<4x256xf32>, i32 -> vector<4x256xf32>
    %cst_136 = arith.constant 0.000000e+00 : f32
    %167 = vector.broadcast %cst_136 : f32 to vector<4x256xf32>
    %168 = arith.select %10, %166, %167 : vector<4x256xi1>, vector<4x256xf32>
    %c20_137 = arith.constant 20 : index
    %c0_138 = arith.constant 0 : index
    %169 = vector.load %arg7[%c20_137, %c0_138] : memref<36x256xf32, #tpu.memory_space<vmem>>, vector<4x256xf32>
    tpu.vector_store %arg7[%c20_137, %c0_138], %168 {strides = array<i32>} : memref<36x256xf32, #tpu.memory_space<vmem>>, vector<4x256xf32>,
    %c241_i32_139 = arith.constant 241 : i32
    %170 = tpu.dynamic_rotate %148 by %c241_i32_139 dim 1 : vector<4x256xf32>, i32 -> vector<4x256xf32>
    %cst_140 = arith.constant 0.000000e+00 : f32
    %171 = vector.broadcast %cst_140 : f32 to vector<4x256xf32>
    %172 = arith.select %13, %170, %171 : vector<4x256xi1>, vector<4x256xf32>
    %c24_141 = arith.constant 24 : index
    %c0_142 = arith.constant 0 : index
    %173 = vector.load %arg7[%c24_141, %c0_142] : memref<36x256xf32, #tpu.memory_space<vmem>>, vector<4x256xf32>
    tpu.vector_store %arg7[%c24_141, %c0_142], %172 {strides = array<i32>} : memref<36x256xf32, #tpu.memory_space<vmem>>, vector<4x256xf32>,
    %c240_i32_143 = arith.constant 240 : i32
    %174 = tpu.dynamic_rotate %148 by %c240_i32_143 dim 1 : vector<4x256xf32>, i32 -> vector<4x256xf32>
    %cst_144 = arith.constant 0.000000e+00 : f32
    %175 = vector.broadcast %cst_144 : f32 to vector<4x256xf32>
    %176 = arith.select %6, %174, %175 : vector<4x256xi1>, vector<4x256xf32>
    %c28_145 = arith.constant 28 : index
    %c0_146 = arith.constant 0 : index
    %177 = vector.load %arg7[%c28_145, %c0_146] : memref<36x256xf32, #tpu.memory_space<vmem>>, vector<4x256xf32>
    tpu.vector_store %arg7[%c28_145, %c0_146], %176 {strides = array<i32>} : memref<36x256xf32, #tpu.memory_space<vmem>>, vector<4x256xf32>,
    %c239_i32_147 = arith.constant 239 : i32
    %178 = tpu.dynamic_rotate %148 by %c239_i32_147 dim 1 : vector<4x256xf32>, i32 -> vector<4x256xf32>
    %cst_148 = arith.constant 0.000000e+00 : f32
    %179 = vector.broadcast %cst_148 : f32 to vector<4x256xf32>
    %180 = arith.select %14, %178, %179 : vector<4x256xi1>, vector<4x256xf32>
    %c32_149 = arith.constant 32 : index
    %c0_150 = arith.constant 0 : index
    %181 = vector.load %arg7[%c32_149, %c0_150] : memref<36x256xf32, #tpu.memory_space<vmem>>, vector<4x256xf32>
    tpu.vector_store %arg7[%c32_149, %c0_150], %180 {strides = array<i32>} : memref<36x256xf32, #tpu.memory_space<vmem>>, vector<4x256xf32>,
    %c0_151 = arith.constant 0 : index
    %c0_152 = arith.constant 0 : index
    %182 = vector.load %arg7[%c0_151, %c0_152] : memref<36x256xf32, #tpu.memory_space<vmem>>, vector<36x256xf32>
    %cst_153 = arith.constant dense<0.000000e+00> : vector<4x256xf32>
    %183 = tpu.matmul %16, %182, %cst_153 {dimension_numbers = #tpu.dot_dimension_numbers<[1], [0], [0], [1], [0, 0, 1, 1], [], []>} : vector<4x36xf32>, vector<36x256xf32>, vector<4x256xf32> -> vector<4x256xf32>
    %184 = vector.broadcast %18 : vector<4x1xf32> to vector<4x256xf32>
    %185 = arith.addf %183, %184 : vector<4x256xf32>
    %cst_154 = arith.constant 0.000000e+00 : f32
    %186 = vector.broadcast %cst_154 : f32 to vector<4x256xf32>
    %187 = arith.cmpf ogt, %185, %186 : vector<4x256xf32>
    %cst_155 = arith.constant 1.000000e-01 : f32
    %188 = vector.broadcast %cst_155 : f32 to vector<4x256xf32>
    %189 = arith.mulf %188, %185 : vector<4x256xf32>
    %190 = arith.select %187, %185, %189 : vector<4x256xi1>, vector<4x256xf32>
    %191 = arith.addf %190, %106 : vector<4x256xf32>
    %c4_156 = arith.constant 4 : index
    %c0_157 = arith.constant 0 : index
    %192 = vector.load %arg6[%c4_156, %c0_157] : memref<8x256xf32, #tpu.memory_space<vmem>>, vector<4x256xf32>
    tpu.vector_store %arg6[%c4_156, %c0_157], %191 {strides = array<i32>} : memref<8x256xf32, #tpu.memory_space<vmem>>, vector<4x256xf32>,
    return
  }
  func.func @transform_0(%arg0: i32) -> (i32, i32) {
    %c0_i32 = arith.constant 0 : i32
    %c0_i32_0 = arith.constant 0 : i32
    return %arg0, %c0_i32 : i32, i32
  }
  func.func @transform_1(%arg0: i32) -> (i32, i32) {
    %c0_i32 = arith.constant 0 : i32
    %c0_i32_0 = arith.constant 0 : i32
    %c0_i32_1 = arith.constant 0 : i32
    return %c0_i32, %c0_i32_0 : i32, i32
  }
  func.func @transform_2(%arg0: i32) -> (i32, i32) {
    %c0_i32 = arith.constant 0 : i32
    %c0_i32_0 = arith.constant 0 : i32
    %c0_i32_1 = arith.constant 0 : i32
    return %c0_i32, %c0_i32_0 : i32, i32
  }
  func.func @transform_3(%arg0: i32) -> (i32, i32) {
    %c0_i32 = arith.constant 0 : i32
    %c0_i32_0 = arith.constant 0 : i32
    %c0_i32_1 = arith.constant 0 : i32
    return %c0_i32, %c0_i32_0 : i32, i32
  }
  func.func @transform_4(%arg0: i32) -> (i32, i32) {
    %c0_i32 = arith.constant 0 : i32
    %c0_i32_0 = arith.constant 0 : i32
    %c0_i32_1 = arith.constant 0 : i32
    return %c0_i32, %c0_i32_0 : i32, i32
  }
  func.func @transform_5(%arg0: i32) -> (i32, i32) {
    %c0_i32 = arith.constant 0 : i32
    %c0_i32_0 = arith.constant 0 : i32
    return %arg0, %c0_i32 : i32, i32
  }
}

</mosaic_0001>

<bundles_post_ra>
// kernel: resnet_block_forward.1
= control target key start
LH: loop header
LB: loop body
LE: loop exit
PB: predicated region body
PF: predicated region fallthrough
CT: control target
= control target key end

     0   :  { %s950_s20 = smov 16   ;;  %s951_s21 = smov 1   ;;  %v958_v5 = vmov 0.0   ;;  %v959_v6 = vmov 0   ;;  %v20_v9 = vlaneseq  ;;  %s1503_s0 = inlined_call_operand.vmem [shape: f32[8,256], index: 0, kind: input, shape index: {}]   ;;  %s1504_s2 = inlined_call_operand.vmem [shape: f32[4,1], index: 2, kind: input, shape index: {}]   ;;  %s1505_s1 = inlined_call_operand.vmem [shape: f32[4,36], index: 1, kind: input, shape index: {}]   ;;  %s1506_s3 = inlined_call_operand.vmem [shape: f32[4,36], index: 3, kind: input, shape index: {}]   ;;  %s1507_s4 = inlined_call_operand.vmem [shape: f32[4,1], index: 4, kind: input, shape index: {}]   ;;  %s1508_s5 = inlined_call_operand.vmem [shape: f32[8,256], index: 5, kind: output, shape index: {}]  }
   0x1   :  { %v993_v0 = vld [vmem:[%s1503_s0] sm:$0xf]  ;;  %v1003_v1 = vld [vmem:[%s1503_s0 + $0x8] sm:$0xf]  ;;  %s952_s24 = smov 17   ;;  %s953_s25 = smov 15   ;;  %251 = vmatprep.mubr.f32.mxu0 %v958_v5  ;;  %458 = vmatprep.mubr.f32.mxu1 %v958_v5 }
   0x2   :  { %58 = vrot.lane.b32.xlu1 %v993_v0, %s950_s20  ;;  %103 = vst [vmem:[#allocation2 + $0x20] sm:$0xf] %v993_v0  ;;  %86 = vrot.lane.b32.xlu0 %v993_v0, %s951_s21  ;;  %104 = vst [vmem:[#allocation2 + $0x28] sm:$0xf] %v1003_v1  ;;  %s954_s26 = smov 127   ;;  %s955_s27 = smov 112  }
   0x3   :  { %s956_s28 = smov 113   ;;  %v476_v2 = vld [vmem:[%s1503_s0 + $0x8] sm:$0xf0]  ;;  %s957_s6 = smov 111   ;;  %v475_v4 = vld [vmem:[%s1503_s0] sm:$0xf0]  ;;  %949 = vset.pattern.permute.xlu0 %v959_v6 }
   0x4   :  { %v1033_v3 = vrot.slane %v476_v2, 4  ;;  %v43_v7 = vld [vmem:[%s1504_s2] sm:$0xf]  ;;  %v1047_v8 = vrot.slane %v475_v4, 4  ;;  %v1073_v10 = vand.u32 127, %v20_v9 }
   0x6   :  { %60 = vrot.lane.b32.xlu1 %v1003_v1, %s950_s20  ;;  %88 = vrot.lane.b32.xlu0 %v1003_v1, %s951_s21  ;;  %v1076_v11 = vadd.s32 128, %v1073_v10  ;;  %v23_v12 = vand.u32 15, %v1073_v10  ;;  %vm62_vm0 = vcmp.lt.s32.totalorder %v1073_v10, 16  ;;  %vm90_vm1 = vcmp.lt.s32.totalorder %v1073_v10, 1 }
   0x7   :  { %vm1516_vm2 = vcmp.ge.s32.totalorder %v1073_v10, 16  ;;  %vm1515_vm5 = vcmp.lt.s32.totalorder %v1073_v10, 17  ;;  %vm1514_vm8 = vcmp.lt.s32.totalorder %v1073_v10, 15  ;;  %vm1510_vm11 = vcmp.lt.s32.totalorder %v1073_v10, 127 }
   0x8   :  { %v24_v13 = vand.u32 15, %v1076_v11  ;;  %vm1083_vm3 = vcmp.ge.s32.totalorder %v23_v12, 1  ;;  %vm1114_vm7 = vcmp.le.s32.totalorder %v23_v12, 14  ;;  %vm1509_vm12 = vcmp.lt.s32.totalorder %v1073_v10, 112 }
   0x9   :  { %vm1110_vm6 = vmand %vm1516_vm2, %vm1083_vm3  ;;  %vm1513_vm13 = vcmp.lt.s32.totalorder %v1076_v11, 240  ;;  %vm1511_vm14 = vcmp.lt.s32.totalorder %v1073_v10, 113 }
   0xa   :  { %49 = vrot.lane.b32.xlu1 %v1003_v1, %s952_s24  ;;  %47 = vrot.lane.b32.xlu0 %v993_v0, %s952_s24  ;;  %vm1087_vm4 = vcmp.ge.s32.totalorder %v24_v13, 1  ;;  %vm1127_vm9 = vcmp.le.s32.totalorder %v24_v13, 14  ;;  %vm1135_vm10 = vmand %vm1516_vm2, %vm1114_vm7 }
   0xb   :  { %vm1169_vm15 = vmand %vm1513_vm13, %vm1087_vm4 }
   0xe   :  { %77 = vrot.lane.b32.xlu1 %v1003_v1, %s953_s25  ;;  %75 = vrot.lane.b32.xlu0 %v993_v0, %s953_s25 }
  0x12   :  { %107 = vrot.lane.b32.xlu1 %v1003_v1, %s954_s26  ;;  %105 = vrot.lane.b32.xlu0 %v993_v0, %s954_s26 }
  0x16   :  { %135 = vrot.lane.b32.xlu1 %v1003_v1, %s955_s27  ;;  %133 = vrot.lane.b32.xlu0 %v993_v0, %s955_s27 }
  0x1a   :  { %124 = vrot.lane.b32.xlu1 %v1003_v1, %s956_s28  ;;  %122 = vrot.lane.b32.xlu0 %v993_v0, %s956_s28 }
  0x1e   :  { %152 = vrot.lane.b32.xlu1 %v1003_v1, %s957_s6  ;;  %150 = vrot.lane.b32.xlu0 %v993_v0, %s957_s6 }
  0x22   :  { %173 = vperm.xlu0 %949, %v43_v7   ;;  %521 = vrot.lane.b32.xlu1 %v1033_v3, %s951_s21 }
  0x26   :  { %519 = vrot.lane.b32.xlu0 %v1047_v8, %s951_s21  ;;  %495 = vrot.lane.b32.xlu1 %v1033_v3, %s950_s20 }
  0x2a   :  { %493 = vrot.lane.b32.xlu0 %v1047_v8, %s950_s20  ;;  %485 = vrot.lane.b32.xlu1 %v1033_v3, %s952_s24 }
  0x2e   :  { %483 = vrot.lane.b32.xlu0 %v1047_v8, %s952_s24  ;;  %511 = vrot.lane.b32.xlu1 %v1033_v3, %s953_s25 }
  0x32   :  { %509 = vrot.lane.b32.xlu0 %v1047_v8, %s953_s25  ;;  %539 = vrot.lane.b32.xlu1 %v1033_v3, %s954_s26 }
  0x36   :  { %537 = vrot.lane.b32.xlu0 %v1047_v8, %s954_s26  ;;  %565 = vrot.lane.b32.xlu1 %v1033_v3, %s955_s27 }
  0x3a   :  { %563 = vrot.lane.b32.xlu0 %v1047_v8, %s955_s27 }
  0x74   :  { %v59_v14 = vpop.permute.xlu1 %58  ;;  %v87_v15 = vpop.permute.xlu0 %86 }
  0x78   :  { %v61_v18 = vpop.permute.xlu1 %60  ;;  %v89_v19 = vpop.permute.xlu0 %88 }
  0x79   :  { %v63_v20 = vsel %vm62_vm0, %v59_v14, %v61_v18  ;;  %v64_v21 = vsel %vm62_vm0, %v61_v18, %v59_v14  ;;  %v91_v22 = vsel %vm90_vm1, %v87_v15, %v89_v19  ;;  %v92_v23 = vsel %vm90_vm1, %v89_v19, %v87_v15 }
  0x7a   :  { %v65_v24 = vsel %vm1516_vm2, %v64_v21, 0.0  ;;  %v70_v25 = vrot.slane %v63_v20, 4  ;;  %v93_v26 = vsel %vm1083_vm3, %v92_v23, 0.0  ;;  %v94_v27 = vsel %vm1087_vm4, %v91_v22, 0.0 }
  0x7b   :  { %v69_v28 = vrot.slane %v65_v24, 4  ;;  %v97_v29 = vrot.slane %v93_v26, 4  ;;  %v98_v30 = vrot.slane %v94_v27, 4 }
  0x7c   :  { %74 = vst [vmem:[#allocation2 + $0x8] sm:$0xf0] %v70_v25  ;;  %v50_v32 = vpop.permute.xlu1 %49  ;;  %v48_v33 = vpop.permute.xlu0 %47 }
  0x7d   :  { %73 = vst [vmem:[#allocation2] sm:$0xf0] %v69_v28  ;;  %101 = vst [vmem:[#allocation2 + $0x10] sm:$0xf0] %v97_v29  ;;  %v52_v35 = vsel %vm1515_vm5, %v48_v33, %v50_v32  ;;  %v53_v36 = vsel %vm1515_vm5, %v50_v32, %v48_v33 }
  0x7e   :  { %102 = vst [vmem:[#allocation2 + $0x18] sm:$0xf0] %v98_v30  ;;  %v54_v37 = vsel %vm1110_vm6, %v53_v36, 0.0  ;;  %v55_v38 = vsel %vm1087_vm4, %v52_v35, 0.0 }
  0x7f   :  { %56 = vst [vmem:[#allocation2] sm:$0xf] %v54_v37  ;;  %57 = vst [vmem:[#allocation2 + $0x8] sm:$0xf] %v55_v38  ;;  %v1202_v37 = vld [vmem:[%s1505_s1] sm:$0xf] }
  0x80   :  { %v78_v41 = vpop.permute.xlu1 %77  ;;  %v76_v42 = vpop.permute.xlu0 %75 }
  0x81   :  { %v80_v43 = vsel %vm1514_vm8, %v76_v42, %v78_v41  ;;  %v81_v44 = vsel %vm1514_vm8, %v78_v41, %v76_v42 }
  0x82   :  { %v82_v45 = vsel %vm1135_vm10, %v81_v44, 0.0  ;;  %v83_v46 = vsel %vm1127_vm9, %v80_v43, 0.0 }
  0x83   :  { %84 = vst [vmem:[#allocation2 + $0x10] sm:$0xf] %v82_v45  ;;  %85 = vst [vmem:[#allocation2 + $0x18] sm:$0xf] %v83_v46 }
  0x84   :  { %v108_v47 = vpop.permute.xlu1 %107  ;;  %v106_v48 = vpop.permute.xlu0 %105 }
  0x85   :  { %v110_v49 = vsel %vm1510_vm11, %v106_v48, %v108_v47  ;;  %v111_v50 = vsel %vm1510_vm11, %v108_v47, %v106_v48  ;;  %vm1186_vm11 = vmand %vm1513_vm13, %vm1127_vm9 }
  0x86   :  { %v112_v51 = vsel %vm1114_vm7, %v110_v49, 0.0  ;;  %v113_v52 = vsel %vm1127_vm9, %v111_v50, 0.0  ;;  %v162_v59 = vld [vmem:[#allocation2 + $0x8] sm:$0xff]  ;;  %v161_v63 = vld [vmem:[#allocation2] sm:$0xff] }
  0x87   :  { %v116_v53 = vrot.slane %v112_v51, 4  ;;  %v117_v54 = vrot.slane %v113_v52, 4 }
  0x88   :  { %v136_v55 = vpop.permute.xlu1 %135  ;;  %v134_v56 = vpop.permute.xlu0 %133 }
  0x89   :  { %120 = vst [vmem:[#allocation2 + $0x20] sm:$0xf0] %v116_v53  ;;  %121 = vst [vmem:[#allocation2 + $0x28] sm:$0xf0] %v117_v54  ;;  %v138_v57 = vsel %vm1509_vm12, %v134_v56, %v136_v55  ;;  %v139_v58 = vsel %vm1509_vm12, %v136_v55, %v134_v56  ;;  %vm1512_vm12 = vcmp.lt.s32.totalorder %v1073_v10, 111 }
  0x8a   :  { %v141_v60 = vsel %vm1513_vm13, %v139_v58, 0.0  ;;  %v144_v61 = vrot.slane %v138_v57, 4  ;;  %v164_v62 = vld [vmem:[#allocation2 + $0x18] sm:$0xff]  ;;  %v163_v2 = vld [vmem:[#allocation2 + $0x10] sm:$0xff] }
  0x8b   :  { %v145_v4 = vrot.slane %v141_v60, 4  ;;  %v907_v7 = vpack.c.bf16 %v164_v62, %v162_v59  ;;  %v909_v9 = vpack.c.bf16 %v163_v2, %v161_v63 }
  0x8c   :  { %148 = vst [vmem:[#allocation2 + $0x30] sm:$0xf0] %v144_v61  ;;  %v125_v12 = vpop.permute.xlu1 %124  ;;  %v123_v13 = vpop.permute.xlu0 %122 }
  0x8d   :  { %149 = vst [vmem:[#allocation2 + $0x38] sm:$0xf0] %v145_v4  ;;  %v127_v14 = vsel %vm1511_vm14, %v123_v13, %v125_v12  ;;  %v128_v15 = vsel %vm1511_vm14, %v125_v12, %v123_v13  ;;  %908 = vmatprep.subr.bf16.mxu0 %v907_v7  ;;  %vm180_vm14 = vcmask 1043456  }
  0x8e   :  { %v129_v18 = vsel %vm1083_vm3, %v127_v14, 0.0  ;;  %v130_v19 = vsel %vm1169_vm15, %v128_v15, 0.0  ;;  %910 = vmatpush1.bf16.msra.mxu0 %v909_v9 }
  0x8f   :  { %131 = vst [vmem:[#allocation2 + $0x30] sm:$0xf] %v129_v18  ;;  %132 = vst [vmem:[#allocation2 + $0x38] sm:$0xf] %v130_v19 }
  0x90   :  { %v153_v21 = vpop.permute.xlu1 %152  ;;  %v151_v22 = vpop.permute.xlu0 %150  ;;  %v166_v27 = vld [vmem:[#allocation2 + $0x28] sm:$0xff]  ;;  %v165_v29 = vld [vmem:[#allocation2 + $0x20] sm:$0xff] }
  0x91   :  { %v155_v23 = vsel %vm1512_vm12, %v151_v22, %v153_v21  ;;  %v156_v24 = vsel %vm1512_vm12, %v153_v21, %v151_v22  ;;  %vm176_vm12 = vcmask 293888  }
  0x92   :  { %v157_v25 = vsel %vm1114_vm7, %v155_v23, 0.0  ;;  %v158_v26 = vsel %vm1186_vm11, %v156_v24, 0.0 }
  0x93   :  { %159 = vst [vmem:[#allocation2 + $0x40] sm:$0xf] %v157_v25  ;;  %160 = vst [vmem:[#allocation2 + $0x48] sm:$0xf] %v158_v26 }
  0x94   :  { %v522_v49 = vpop.permute.xlu1 %521 }
  0x96   :  { %v168_v28 = vld [vmem:[#allocation2 + $0x38] sm:$0xff]  ;;  %v167_v30 = vld [vmem:[#allocation2 + $0x30] sm:$0xff] }
  0x97   :  { %v911_v32 = vpack.c.bf16 %v168_v28, %v166_v27  ;;  %v913_v33 = vpack.c.bf16 %v167_v30, %v165_v29 }
  0x98   :  { %v496_v51 = vpop.permute.xlu1 %495 }
  0x99   :  { %912 = vmatprep.subr.bf16.mxu0 %v911_v32 }
  0x9a   :  { %914 = vmatpush1.bf16.msra.mxu0 %v913_v33  ;;  %v170_v35 = vld [vmem:[#allocation2 + $0x48] sm:$0xf]  ;;  %v169_v36 = vld [vmem:[#allocation2 + $0x40] sm:$0xf] }
  0x9b   :  { %895 = vmatprep.subr.msk.mxu0 %vm180_vm14, %v170_v35 }
  0x9c   :  { %v486_v53 = vpop.permute.xlu1 %485 }
  0x9e   :  { %896 = vmatpush1.msk.msra.mxu0 %vm180_vm14, %v169_v36 }
  0x9f   :  { %897 = vmatmul.mubr.msk.f32.vlgmr.msra.gmra.mrb[0].mxu0 %vm176_vm12, %v1202_v37 }
  0xa0   :  { %669 = vmatprep.mubr.f32.mxu0 %v958_v5  ;;  %v1236_v55 = vpop.permute.xlu1 %511 }
  0xa1   :  { %v1208_v38 = vpop.permute.xlu0 %173 }
  0xa4   :  { %v1240_v57 = vpop.permute.xlu1 %539 }
  0xa5   :  { %v520_v50 = vpop.permute.xlu0 %519 }
  0xa6   :  { %v523_v35 = vsel %vm90_vm1, %v520_v50, %v522_v49  ;;  %v524_v36 = vsel %vm90_vm1, %v522_v49, %v520_v50 }
  0xa7   :  { %v525_v50 = vsel %vm1083_vm3, %v524_v36, 0.0 }
  0xa8   :  { %v1244_v59 = vpop.permute.xlu1 %565 }
  0xa9   :  { %v494_v52 = vpop.permute.xlu0 %493 }
  0xaa   :  { %v498_v32 = vsel %vm62_vm0, %v496_v51, %v494_v52 }
  0xad   :  { %v484_v54 = vpop.permute.xlu0 %483 }
  0xae   :  { %v488_v49 = vsel %vm1515_vm5, %v486_v53, %v484_v54 }
  0xb1   :  { %v1238_v56 = vpop.permute.xlu0 %509 }
  0xb5   :  { %v1242_v58 = vpop.permute.xlu0 %537 }
  0xb9   :  { %v1246_v60 = vpop.permute.xlu0 %563 }
 0x172   :  { %v253_v41 = vpop.f32.mrb[0].mxu0 }
 0x173   :  { %v254_v42 = vadd.f32 %v253_v41, %v1208_v38  ;;  %v255_v43 = vpop.f32.mrb[1].mxu0 }
 0x174   :  { %v256_v44 = vadd.f32 %v255_v43, %v1208_v38  ;;  %v497_v43 = vsel %vm62_vm0, %v494_v52, %v496_v51  ;;  %v526_v51 = vsel %vm1087_vm4, %v523_v35, 0.0 }
 0x175   :  { %vm258_vm13 = vcmp.gt.f32.partialorder %v254_v42, 0.0  ;;  %v260_v45 = vmul.f32 0.1, %v254_v42 }
 0x176   :  { %vm259_vm8 = vcmp.gt.f32.partialorder %v256_v44, 0.0  ;;  %v261_v46 = vmul.f32 0.1, %v256_v44 }
 0x177   :  { %v262_v47 = vsel %vm258_vm13, %v254_v42, %v260_v45 }
 0x178   :  { %316 = vst [vmem:[#allocation2 + $0x20] sm:$0xf] %v262_v47  ;;  %v263_v48 = vsel %vm259_vm8, %v256_v44, %v261_v46  ;;  %274 = vrot.lane.b32.xlu0 %v262_v47, %s950_s20  ;;  %300 = vrot.lane.b32.xlu1 %v262_v47, %s951_s21  ;;  %vm1533_vm8 = vcmp.lt.s32.totalorder %v1073_v10, 15  ;;  %v499_v44 = vsel %vm1516_vm2, %v498_v32, 0.0 }
 0x179   :  { %317 = vst [vmem:[#allocation2 + $0x28] sm:$0xf] %v263_v48  ;;  %vm1534_vm13 = vmmov %vm1533_vm8 }
 0x17c   :  { %264 = vrot.lane.b32.xlu0 %v262_v47, %s952_s24  ;;  %302 = vrot.lane.b32.xlu1 %v263_v48, %s951_s21 }
 0x180   :  { %290 = vrot.lane.b32.xlu0 %v262_v47, %s953_s25  ;;  %276 = vrot.lane.b32.xlu1 %v263_v48, %s950_s20 }
 0x184   :  { %318 = vrot.lane.b32.xlu0 %v262_v47, %s954_s26  ;;  %266 = vrot.lane.b32.xlu1 %v263_v48, %s952_s24 }
 0x188   :  { %344 = vrot.lane.b32.xlu0 %v262_v47, %s955_s27  ;;  %292 = vrot.lane.b32.xlu1 %v263_v48, %s953_s25 }
 0x18c   :  { %334 = vrot.lane.b32.xlu0 %v262_v47, %s956_s28  ;;  %320 = vrot.lane.b32.xlu1 %v263_v48, %s954_s26 }
 0x190   :  { %360 = vrot.lane.b32.xlu0 %v262_v47, %s957_s6  ;;  %346 = vrot.lane.b32.xlu1 %v263_v48, %s955_s27 }
 0x194   :  { %336 = vrot.lane.b32.xlu1 %v263_v48, %s956_s28  ;;  %553 = vrot.lane.b32.xlu0 %v1047_v8, %s956_s28 }
 0x198   :  { %362 = vrot.lane.b32.xlu1 %v263_v48, %s957_s6  ;;  %579 = vrot.lane.b32.xlu0 %v1047_v8, %s957_s6  ;;  %v487_v48 = vsel %vm1515_vm5, %v484_v54, %v486_v53  ;;  %v489_v53 = vsel %vm1110_vm6, %v488_v49, 0.0 }
 0x199   :  { %v490_v54 = vsel %vm1087_vm4, %v487_v48, 0.0 }
 0x19c   :  { %555 = vrot.lane.b32.xlu1 %v1033_v3, %s956_s28 }
 0x1a0   :  { %581 = vrot.lane.b32.xlu1 %v1033_v3, %s957_s6 }
 0x1ea   :  { %v275_v61 = vpop.permute.xlu0 %274  ;;  %v301_v62 = vpop.permute.xlu1 %300 }
 0x1ee   :  { %v265_v63 = vpop.permute.xlu0 %264  ;;  %v303_v2 = vpop.permute.xlu1 %302 }
 0x1ef   :  { %v304_v4 = vsel %vm90_vm1, %v301_v62, %v303_v2  ;;  %v305_v7 = vsel %vm90_vm1, %v303_v2, %v301_v62  ;;  %v504_v62 = vrot.slane %v497_v43, 4 }
 0x1f0   :  { %v306_v9 = vsel %vm1083_vm3, %v305_v7, 0.0  ;;  %v307_v12 = vsel %vm1087_vm4, %v304_v4, 0.0 }
 0x1f1   :  { %v310_v13 = vrot.slane %v306_v9, 4  ;;  %v311_v14 = vrot.slane %v307_v12, 4 }
 0x1f2   :  { %v291_v15 = vpop.permute.xlu0 %290  ;;  %v277_v18 = vpop.permute.xlu1 %276 }
 0x1f3   :  { %314 = vst [vmem:[#allocation2 + $0x10] sm:$0xf0] %v310_v13  ;;  %315 = vst [vmem:[#allocation2 + $0x18] sm:$0xf0] %v311_v14  ;;  %v278_v19 = vsel %vm62_vm0, %v275_v61, %v277_v18  ;;  %v279_v21 = vsel %vm62_vm0, %v277_v18, %v275_v61  ;;  %v503_v61 = vrot.slane %v499_v44, 4 }
 0x1f4   :  { %v280_v22 = vsel %vm1516_vm2, %v279_v21, 0.0  ;;  %v285_v23 = vrot.slane %v278_v19, 4  ;;  %v529_v19 = vrot.slane %v525_v50, 4  ;;  %v530_v21 = vrot.slane %v526_v51, 4 }
 0x1f5   :  { %v284_v24 = vrot.slane %v280_v22, 4 }
 0x1f6   :  { %289 = vst [vmem:[#allocation2 + $0x8] sm:$0xf0] %v285_v23  ;;  %v319_v25 = vpop.permute.xlu0 %318  ;;  %v267_v26 = vpop.permute.xlu1 %266 }
 0x1f7   :  { %288 = vst [vmem:[#allocation2] sm:$0xf0] %v284_v24  ;;  %v268_v27 = vsel %vm1515_vm5, %v265_v63, %v267_v26  ;;  %v269_v28 = vsel %vm1515_vm5, %v267_v26, %v265_v63  ;;  %vm1539_vm5 = vcmp.lt.s32.totalorder %v1073_v10, 127 }
 0x1f8   :  { %v270_v29 = vsel %vm1110_vm6, %v269_v28, 0.0  ;;  %v271_v30 = vsel %vm1087_vm4, %v268_v27, 0.0  ;;  %v541_v24 = vsel %vm1539_vm5, %v1242_v58, %v1240_v57 }
 0x1f9   :  { %272 = vst [vmem:[#allocation2] sm:$0xf] %v270_v29  ;;  %273 = vst [vmem:[#allocation2 + $0x8] sm:$0xf] %v271_v30  ;;  %v543_v35 = vsel %vm1114_vm7, %v541_v24, 0.0 }
 0x1fa   :  { %v293_v33 = vpop.permute.xlu1 %292  ;;  %v345_v45 = vpop.permute.xlu0 %344 }
 0x1fb   :  { %v294_v41 = vsel %vm1533_vm8, %v291_v15, %v293_v33  ;;  %v295_v42 = vsel %vm1534_vm13, %v293_v33, %v291_v15  ;;  %vm1535_vm8 = vcmp.lt.s32.totalorder %v1073_v10, 127 }
 0x1fc   :  { %v296_v46 = vsel %vm1135_vm10, %v295_v42, 0.0  ;;  %v297_v47 = vsel %vm1127_vm9, %v294_v41, 0.0  ;;  %vm1536_vm13 = vmmov %vm1535_vm8 }
 0x1fd   :  { %298 = vst [vmem:[#allocation2 + $0x10] sm:$0xf] %v296_v46  ;;  %299 = vst [vmem:[#allocation2 + $0x18] sm:$0xf] %v297_v47  ;;  %v547_v47 = vrot.slane %v543_v35, 4 }
 0x1fe   :  { %v321_v52 = vpop.permute.xlu1 %320  ;;  %v335_v22 = vpop.permute.xlu0 %334 }
 0x1ff   :  { %v322_v63 = vsel %vm1535_vm8, %v319_v25, %v321_v52  ;;  %v323_v2 = vsel %vm1536_vm13, %v321_v52, %v319_v25  ;;  %vm1537_vm8 = vcmp.lt.s32.totalorder %v1073_v10, 15 }
 0x200   :  { %v324_v4 = vsel %vm1114_vm7, %v322_v63, 0.0  ;;  %v325_v7 = vsel %vm1127_vm9, %v323_v2, 0.0  ;;  %v371_v9 = vld [vmem:[#allocation2 + $0x8] sm:$0xff]  ;;  %v370_v12 = vld [vmem:[#allocation2] sm:$0xff]  ;;  %v513_v13 = vsel %vm1537_vm8, %v1238_v56, %v1236_v55  ;;  %vm1538_vm13 = vmmov %vm1537_vm8 }
 0x201   :  { %v514_v14 = vsel %vm1538_vm13, %v1236_v55, %v1238_v56  ;;  %v328_v15 = vrot.slane %v324_v4, 4  ;;  %v329_v18 = vrot.slane %v325_v7, 4  ;;  %492 = vst [vmem:[#allocation2 + $0x8] sm:$0xf] %v490_v54  ;;  %508 = vst [vmem:[#allocation2 + $0x8] sm:$0xf0] %v504_v62 }
 0x202   :  { %491 = vst [vmem:[#allocation2] sm:$0xf] %v489_v53  ;;  %507 = vst [vmem:[#allocation2] sm:$0xf0] %v503_v61  ;;  %v347_v23 = vpop.permute.xlu1 %346  ;;  %vm1541_vm13 = vcmp.lt.s32.totalorder %v1073_v10, 112  ;;  %v515_v26 = vsel %vm1135_vm10, %v514_v14, 0.0  ;;  %v361_v44 = vpop.permute.xlu0 %360 }
 0x203   :  { %vm1540_vm8 = vmmov %vm1539_vm5  ;;  %332 = vst [vmem:[#allocation2 + $0x20] sm:$0xf0] %v328_v15  ;;  %v348_v56 = vsel %vm1541_vm13, %v345_v45, %v347_v23  ;;  %v516_v27 = vsel %vm1127_vm9, %v513_v13, 0.0  ;;  %vm1543_vm5 = vcmp.lt.s32.totalorder %v1076_v11, 240  ;;  %v568_v49 = vsel %vm1541_vm13, %v1244_v59, %v1246_v60 }
 0x204   :  { %v542_v55 = vsel %vm1540_vm8, %v1240_v57, %v1242_v58  ;;  %333 = vst [vmem:[#allocation2 + $0x28] sm:$0xf0] %v329_v18  ;;  %vm1542_vm2 = vmmov %vm1541_vm13  ;;  %v354_v29 = vrot.slane %v348_v56, 4  ;;  %v373_v30 = vld [vmem:[#allocation2 + $0x18] sm:$0xff]  ;;  %v372_v57 = vld [vmem:[#allocation2 + $0x10] sm:$0xff] }
 0x205   :  { %v349_v25 = vsel %vm1542_vm2, %v347_v23, %v345_v45  ;;  %v915_v32 = vpack.c.bf16 %v373_v30, %v371_v9  ;;  %518 = vst [vmem:[#allocation2 + $0x18] sm:$0xf] %v516_v27  ;;  %534 = vst [vmem:[#allocation2 + $0x18] sm:$0xf0] %v530_v21  ;;  %v917_v33 = vpack.c.bf16 %v372_v57, %v370_v12  ;;  %v544_v36 = vsel %vm1127_vm9, %v542_v55, 0.0 }
 0x206   :  { %v351_v28 = vsel %vm1543_vm5, %v349_v25, 0.0  ;;  %517 = vst [vmem:[#allocation2 + $0x10] sm:$0xf] %v515_v26  ;;  %533 = vst [vmem:[#allocation2 + $0x10] sm:$0xf0] %v529_v19  ;;  %v337_v41 = vpop.permute.xlu1 %336  ;;  %vm1544_vm2 = vcmp.lt.s32.totalorder %v1073_v10, 113  ;;  %v554_v7 = vpop.permute.xlu0 %553 }
 0x207   :  { %v355_v58 = vrot.slane %v351_v28, 4  ;;  %358 = vst [vmem:[#allocation2 + $0x30] sm:$0xf0] %v354_v29  ;;  %v338_v42 = vsel %vm1544_vm2, %v335_v22, %v337_v41  ;;  %vm1545_vm8 = vmmov %vm1544_vm2  ;;  %916 = vmatprep.subr.bf16.mxu1 %v915_v32  ;;  %v548_v48 = vrot.slane %v544_v36, 4  ;;  %vm1546_vm5 = vcmp.lt.s32.totalorder %v1073_v10, 111 }
 0x208   :  { %v339_v43 = vsel %vm1545_vm8, %v337_v41, %v335_v22  ;;  %v340_v45 = vsel %vm1083_vm3, %v338_v42, 0.0  ;;  %918 = vmatpush1.bf16.msra.mxu1 %v917_v33  ;;  %vm1547_vm2 = vmmov %vm1546_vm5  ;;  %v590_v63 = vld [vmem:[#allocation2 + $0x8] sm:$0xff]  ;;  %v1386_v33 = vld [vmem:[%s1506_s3] sm:$0xf] }
 0x209   :  { %359 = vst [vmem:[#allocation2 + $0x38] sm:$0xf0] %v355_v58  ;;  %v341_v46 = vsel %vm1169_vm15, %v339_v43, 0.0  ;;  %342 = vst [vmem:[#allocation2 + $0x30] sm:$0xf] %v340_v45  ;;  %v589_v12 = vld [vmem:[#allocation2] sm:$0xff] }
 0x20a   :  { %343 = vst [vmem:[#allocation2 + $0x38] sm:$0xf] %v341_v46  ;;  %v363_v50 = vpop.permute.xlu1 %362  ;;  %v374_v52 = vld [vmem:[#allocation2 + $0x20] sm:$0xff]  ;;  %vm1548_vm8 = vmmov %vm1541_vm13  ;;  %vm1549_vm13 = vcmp.lt.s32.totalorder %v1076_v11, 240  ;;  %v580_v56 = vpop.permute.xlu0 %579 }
 0x20b   :  { %v375_v51 = vld [vmem:[#allocation2 + $0x28] sm:$0xff]  ;;  %v364_v61 = vsel %vm1546_vm5, %v361_v44, %v363_v50  ;;  %v365_v62 = vsel %vm1547_vm2, %v363_v50, %v361_v44  ;;  %535 = vst [vmem:[#allocation2 + $0x20] sm:$0xf] %v1047_v8  ;;  %551 = vst [vmem:[#allocation2 + $0x20] sm:$0xf0] %v547_v47  ;;  %v567_v2 = vsel %vm1548_vm8, %v1246_v60, %v1244_v59  ;;  %v570_v53 = vsel %vm1549_vm13, %v568_v49, 0.0 }
 0x20c   :  { %536 = vst [vmem:[#allocation2 + $0x28] sm:$0xf] %v1033_v3  ;;  %552 = vst [vmem:[#allocation2 + $0x28] sm:$0xf0] %v548_v48  ;;  %v366_v54 = vsel %vm1114_vm7, %v364_v61, 0.0  ;;  %v367_v4 = vsel %vm1186_vm11, %v365_v62, 0.0 }
 0x20d   :  { %v592_v9 = vld [vmem:[#allocation2 + $0x18] sm:$0xff]  ;;  %v591_v13 = vld [vmem:[#allocation2 + $0x10] sm:$0xff]  ;;  %368 = vst [vmem:[#allocation2 + $0x40] sm:$0xf] %v366_v54  ;;  %369 = vst [vmem:[#allocation2 + $0x48] sm:$0xf] %v367_v4 }
 0x20e   :  { %v923_v14 = vpack.c.bf16 %v592_v9, %v590_v63  ;;  %v925_v15 = vpack.c.bf16 %v591_v13, %v589_v12  ;;  %v556_v18 = vpop.permute.xlu1 %555  ;;  %v573_v19 = vrot.slane %v567_v2, 4  ;;  %v574_v59 = vrot.slane %v570_v53, 4 }
 0x20f   :  { %vm1550_vm5 = vcmp.lt.s32.totalorder %v1073_v10, 113  ;;  %vm1552_vm8 = vcmp.lt.s32.totalorder %v1073_v10, 111 }
 0x210   :  { %v557_v60 = vsel %vm1550_vm5, %v554_v7, %v556_v18  ;;  %vm1551_vm2 = vmmov %vm1550_vm5  ;;  %924 = vmatprep.subr.bf16.mxu0 %v923_v14  ;;  %v376_v22 = vld [vmem:[#allocation2 + $0x30] sm:$0xff] }
 0x211   :  { %v558_v21 = vsel %vm1551_vm2, %v556_v18, %v554_v7  ;;  %v377_v23 = vld [vmem:[#allocation2 + $0x38] sm:$0xff]  ;;  %v559_v24 = vsel %vm1083_vm3, %v557_v60, 0.0  ;;  %926 = vmatpush1.bf16.msra.mxu0 %v925_v15  ;;  %577 = vst [vmem:[#allocation2 + $0x30] sm:$0xf0] %v573_v19  ;;  %v921_v26 = vpack.c.bf16 %v376_v22, %v374_v52  ;;  %vm1553_vm13 = vmmov %vm1552_vm8 }
 0x212   :  { %v560_v55 = vsel %vm1169_vm15, %v558_v21, 0.0  ;;  %578 = vst [vmem:[#allocation2 + $0x38] sm:$0xf0] %v574_v59  ;;  %561 = vst [vmem:[#allocation2 + $0x30] sm:$0xf] %v559_v24  ;;  %v919_v25 = vpack.c.bf16 %v377_v23, %v375_v51  ;;  %v582_v27 = vpop.permute.xlu1 %581  ;;  %v593_v41 = vld [vmem:[#allocation2 + $0x20] sm:$0xff] }
 0x213   :  { %562 = vst [vmem:[#allocation2 + $0x38] sm:$0xf] %v560_v55  ;;  %v583_v28 = vsel %vm1552_vm8, %v580_v56, %v582_v27  ;;  %v584_v29 = vsel %vm1553_vm13, %v582_v27, %v580_v56  ;;  %v594_v35 = vld [vmem:[#allocation2 + $0x28] sm:$0xff]  ;;  %vm1555_vm8 = vcmp.lt.s32.totalorder %v1073_v10, 17 }
 0x214   :  { %920 = vmatprep.subr.bf16.mxu1 %v919_v25  ;;  %v585_v30 = vsel %vm1114_vm7, %v583_v28, 0.0  ;;  %v586_v57 = vsel %vm1186_vm11, %v584_v29, 0.0  ;;  %v379_v58 = vld [vmem:[#allocation2 + $0x48] sm:$0xf]  ;;  %v378_v32 = vld [vmem:[#allocation2 + $0x40] sm:$0xf]  ;;  %vm1556_vm13 = vmmov %vm1555_vm8 }
 0x215   :  { %922 = vmatpush1.bf16.msra.mxu1 %v921_v26  ;;  %588 = vst [vmem:[#allocation2 + $0x48] sm:$0xf] %v586_v57  ;;  %587 = vst [vmem:[#allocation2 + $0x40] sm:$0xf] %v585_v30 }
 0x216   :  { %898 = vmatprep.subr.msk.mxu1 %vm180_vm14, %v379_v58 }
 0x219   :  { %899 = vmatpush1.msk.msra.mxu1 %vm180_vm14, %v378_v32  ;;  %v595_v42 = vld [vmem:[#allocation2 + $0x30] sm:$0xff] }
 0x21a   :  { %v596_v36 = vld [vmem:[#allocation2 + $0x38] sm:$0xff]  ;;  %v929_v44 = vpack.c.bf16 %v595_v42, %v593_v41  ;;  %900 = vmatmul.mubr.msk.f32.vlgmr.msra.gmra.mrb[0].mxu1 %vm176_vm12, %v1386_v33 }
 0x21b   :  { %v927_v43 = vpack.c.bf16 %v596_v36, %v594_v35  ;;  %868 = vmatprep.mubr.f32.mxu1 %v958_v5 }
 0x21c   :  { %v598_v45 = vld [vmem:[#allocation2 + $0x48] sm:$0xf]  ;;  %v597_v46 = vld [vmem:[#allocation2 + $0x40] sm:$0xf] }
 0x21d   :  { %928 = vmatprep.subr.bf16.mxu0 %v927_v43 }
 0x21e   :  { %930 = vmatpush1.bf16.msra.mxu0 %v929_v44 }
 0x21f   :  { %901 = vmatprep.subr.msk.mxu0 %vm180_vm14, %v598_v45 }
 0x222   :  { %902 = vmatpush1.msk.msra.mxu0 %vm180_vm14, %v597_v46 }
 0x223   :  { %903 = vmatmul.mubr.msk.f32.vlgmr.msra.gmra.mrb[2].mxu0 %vm176_vm12, %v1202_v37  ;;  %v44_v37 = vld [vmem:[%s1507_s4] sm:$0xf] }
 0x2f6   :  { %v671_v47 = vpop.f32.mrb[2].mxu0 }
 0x2f7   :  { %v672_v48 = vadd.f32 %v671_v47, %v1208_v38  ;;  %v673_v49 = vpop.f32.mrb[3].mxu0 }
 0x2f8   :  { %v674_v50 = vadd.f32 %v673_v49, %v1208_v38  ;;  %v1417_v38 = vpop.f32.mrb[0].mxu1 }
 0x2f9   :  { %vm676_vm5 = vcmp.gt.f32.partialorder %v672_v48, 0.0  ;;  %v678_v51 = vmul.f32 0.1, %v672_v48  ;;  %v1419_v62 = vpop.f32.mrb[1].mxu1 }
 0x2fa   :  { %vm677_vm2 = vcmp.gt.f32.partialorder %v674_v50, 0.0  ;;  %v679_v5 = vmul.f32 0.1, %v674_v50 }
 0x2fb   :  { %v680_v52 = vsel %vm676_vm5, %v672_v48, %v678_v51 }
 0x2fc   :  { %734 = vst [vmem:[#allocation2 + $0x20] sm:$0xf] %v680_v52  ;;  %v681_v61 = vsel %vm677_vm2, %v674_v50, %v679_v5  ;;  %718 = vrot.lane.b32.xlu0 %v680_v52, %s951_s21 }
 0x2fd   :  { %735 = vst [vmem:[#allocation2 + $0x28] sm:$0xf] %v681_v61  ;;  %720 = vrot.lane.b32.xlu1 %v681_v61, %s951_s21 }
 0x300   :  { %692 = vrot.lane.b32.xlu0 %v680_v52, %s950_s20 }
 0x301   :  { %694 = vrot.lane.b32.xlu1 %v681_v61, %s950_s20 }
 0x304   :  { %682 = vrot.lane.b32.xlu0 %v680_v52, %s952_s24 }
 0x305   :  { %684 = vrot.lane.b32.xlu1 %v681_v61, %s952_s24 }
 0x308   :  { %708 = vrot.lane.b32.xlu0 %v680_v52, %s953_s25 }
 0x309   :  { %710 = vrot.lane.b32.xlu1 %v681_v61, %s953_s25 }
 0x30c   :  { %736 = vrot.lane.b32.xlu0 %v680_v52, %s954_s26 }
 0x30d   :  { %738 = vrot.lane.b32.xlu1 %v681_v61, %s954_s26 }
 0x310   :  { %762 = vrot.lane.b32.xlu0 %v680_v52, %s955_s27 }
 0x311   :  { %764 = vrot.lane.b32.xlu1 %v681_v61, %s955_s27 }
 0x314   :  { %752 = vrot.lane.b32.xlu0 %v680_v52, %s956_s28 }
 0x315   :  { %754 = vrot.lane.b32.xlu1 %v681_v61, %s956_s28 }
 0x318   :  { %778 = vrot.lane.b32.xlu0 %v680_v52, %s957_s6 }
 0x319   :  { %780 = vrot.lane.b32.xlu1 %v681_v61, %s957_s6 }
 0x31c   :  { %382 = vperm.xlu0 %949, %v44_v37  }
 0x36e   :  { %v719_v63 = vpop.permute.xlu0 %718 }
 0x36f   :  { %v721_v2 = vpop.permute.xlu1 %720 }
 0x370   :  { %v722_v53 = vsel %vm90_vm1, %v719_v63, %v721_v2  ;;  %v723_v54 = vsel %vm90_vm1, %v721_v2, %v719_v63  ;;  %vm1554_vm1 = vcmp.ge.s32.totalorder %v1073_v10, 16 }
 0x371   :  { %v724_v4 = vsel %vm1083_vm3, %v723_v54, 0.0  ;;  %v725_v7 = vsel %vm1087_vm4, %v722_v53, 0.0 }
 0x372   :  { %v728_v9 = vrot.slane %v724_v4, 4  ;;  %v729_v12 = vrot.slane %v725_v7, 4  ;;  %v693_v13 = vpop.permute.xlu0 %692 }
 0x373   :  { %v695_v14 = vpop.permute.xlu1 %694 }
 0x374   :  { %732 = vst [vmem:[#allocation2 + $0x10] sm:$0xf0] %v728_v9  ;;  %733 = vst [vmem:[#allocation2 + $0x18] sm:$0xf0] %v729_v12  ;;  %v696_v15 = vsel %vm62_vm0, %v693_v13, %v695_v14  ;;  %v697_v18 = vsel %vm62_vm0, %v695_v14, %v693_v13  ;;  %vm1557_vm0 = vcmp.lt.s32.totalorder %v1073_v10, 15 }
 0x375   :  { %v698_v19 = vsel %vm1554_vm1, %v697_v18, 0.0  ;;  %v703_v59 = vrot.slane %v696_v15, 4  ;;  %vm1558_vm5 = vmmov %vm1557_vm0  ;;  %vm1563_vm1 = vcmp.lt.s32.totalorder %v1076_v11, 240 }
 0x376   :  { %v702_v60 = vrot.slane %v698_v19, 4  ;;  %v683_v21 = vpop.permute.xlu0 %682 }
 0x377   :  { %707 = vst [vmem:[#allocation2 + $0x8] sm:$0xf0] %v703_v59  ;;  %v685_v22 = vpop.permute.xlu1 %684 }
 0x378   :  { %706 = vst [vmem:[#allocation2] sm:$0xf0] %v702_v60  ;;  %v686_v23 = vsel %vm1555_vm8, %v683_v21, %v685_v22  ;;  %v687_v24 = vsel %vm1556_vm13, %v685_v22, %v683_v21  ;;  %vm1566_vm13 = vcmp.lt.s32.totalorder %v1073_v10, 111 }
 0x379   :  { %v688_v55 = vsel %vm1110_vm6, %v687_v24, 0.0  ;;  %v689_v56 = vsel %vm1087_vm4, %v686_v23, 0.0  ;;  %vm1559_vm4 = vcmp.lt.s32.totalorder %v1073_v10, 127 }
 0x37a   :  { %690 = vst [vmem:[#allocation2] sm:$0xf] %v688_v55  ;;  %691 = vst [vmem:[#allocation2 + $0x8] sm:$0xf] %v689_v56  ;;  %v709_v25 = vpop.permute.xlu0 %708 }
 0x37b   :  { %v711_v26 = vpop.permute.xlu1 %710  ;;  %vm1560_vm6 = vmmov %vm1559_vm4 }
 0x37c   :  { %v712_v27 = vsel %vm1557_vm0, %v709_v25, %v711_v26  ;;  %v713_v28 = vsel %vm1558_vm5, %v711_v26, %v709_v25  ;;  %vm1567_vm0 = vmmov %vm1566_vm13 }
 0x37d   :  { %v714_v29 = vsel %vm1135_vm10, %v713_v28, 0.0  ;;  %v715_v31 = vsel %vm1127_vm9, %v712_v27, 0.0  ;;  %vm1561_vm10 = vcmp.lt.s32.totalorder %v1073_v10, 112 }
 0x37e   :  { %716 = vst [vmem:[#allocation2 + $0x10] sm:$0xf] %v714_v29  ;;  %717 = vst [vmem:[#allocation2 + $0x18] sm:$0xf] %v715_v31  ;;  %v737_v17 = vpop.permute.xlu0 %736 }
 0x37f   :  { %v739_v30 = vpop.permute.xlu1 %738  ;;  %vm1562_vm2 = vmmov %vm1561_vm10 }
 0x380   :  { %v740_v57 = vsel %vm1559_vm4, %v737_v17, %v739_v30  ;;  %v741_v58 = vsel %vm1560_vm6, %v739_v30, %v737_v17 }
 0x381   :  { %v742_v32 = vsel %vm1114_vm7, %v740_v57, 0.0  ;;  %v743_v40 = vsel %vm1127_vm9, %v741_v58, 0.0  ;;  %v789_v45 = vld [vmem:[#allocation2 + $0x8] sm:$0xff]  ;;  %v788_v39 = vld [vmem:[#allocation2] sm:$0xff]  ;;  %vm1564_vm9 = vcmp.lt.s32.totalorder %v1073_v10, 113 }
 0x382   :  { %v746_v35 = vrot.slane %v742_v32, 4  ;;  %v747_v36 = vrot.slane %v743_v40, 4  ;;  %v763_v41 = vpop.permute.xlu0 %762  ;;  %vm1565_vm8 = vmmov %vm1564_vm9 }
 0x383   :  { %v765_v42 = vpop.permute.xlu1 %764 }
 0x384   :  { %750 = vst [vmem:[#allocation2 + $0x20] sm:$0xf0] %v746_v35  ;;  %751 = vst [vmem:[#allocation2 + $0x28] sm:$0xf0] %v747_v36  ;;  %v766_v43 = vsel %vm1561_vm10, %v763_v41, %v765_v42  ;;  %v767_v44 = vsel %vm1562_vm2, %v765_v42, %v763_v41 }
 0x385   :  { %v769_v46 = vsel %vm1563_vm1, %v767_v44, 0.0  ;;  %v772_v47 = vrot.slane %v766_v43, 4  ;;  %v791_v48 = vld [vmem:[#allocation2 + $0x18] sm:$0xff]  ;;  %v790_v49 = vld [vmem:[#allocation2 + $0x10] sm:$0xff] }
 0x386   :  { %v773_v50 = vrot.slane %v769_v46, 4  ;;  %v753_v51 = vpop.permute.xlu0 %752  ;;  %v931_v5 = vpack.c.bf16 %v791_v48, %v789_v45  ;;  %v933_v52 = vpack.c.bf16 %v790_v49, %v788_v39 }
 0x387   :  { %776 = vst [vmem:[#allocation2 + $0x30] sm:$0xf0] %v772_v47  ;;  %v755_v61 = vpop.permute.xlu1 %754 }
 0x388   :  { %777 = vst [vmem:[#allocation2 + $0x38] sm:$0xf0] %v773_v50  ;;  %v756_v37 = vsel %vm1564_vm9, %v753_v51, %v755_v61  ;;  %v757_v63 = vsel %vm1565_vm8, %v755_v61, %v753_v51  ;;  %932 = vmatprep.subr.bf16.mxu1 %v931_v5 }
 0x389   :  { %v758_v11 = vsel %vm1083_vm3, %v756_v37, 0.0  ;;  %v759_v2 = vsel %vm1169_vm15, %v757_v63, 0.0  ;;  %934 = vmatpush1.bf16.msra.mxu1 %v933_v52 }
 0x38a   :  { %760 = vst [vmem:[#allocation2 + $0x30] sm:$0xf] %v758_v11  ;;  %761 = vst [vmem:[#allocation2 + $0x38] sm:$0xf] %v759_v2  ;;  %v779_v53 = vpop.permute.xlu0 %778 }
 0x38b   :  { %v781_v54 = vpop.permute.xlu1 %780  ;;  %v793_v6 = vld [vmem:[#allocation2 + $0x28] sm:$0xff]  ;;  %v792_v13 = vld [vmem:[#allocation2 + $0x20] sm:$0xff] }
 0x38c   :  { %v782_v4 = vsel %vm1566_vm13, %v779_v53, %v781_v54  ;;  %v783_v7 = vsel %vm1567_vm0, %v781_v54, %v779_v53 }
 0x38d   :  { %v784_v9 = vsel %vm1114_vm7, %v782_v4, 0.0  ;;  %v785_v16 = vsel %vm1186_vm11, %v783_v7, 0.0 }
 0x38e   :  { %786 = vst [vmem:[#allocation2 + $0x40] sm:$0xf] %v784_v9  ;;  %787 = vst [vmem:[#allocation2 + $0x48] sm:$0xf] %v785_v16 }
 0x391   :  { %v795_v12 = vld [vmem:[#allocation2 + $0x38] sm:$0xff]  ;;  %v794_v14 = vld [vmem:[#allocation2 + $0x30] sm:$0xff] }
 0x392   :  { %v935_v15 = vpack.c.bf16 %v795_v12, %v793_v6  ;;  %v937_v18 = vpack.c.bf16 %v794_v14, %v792_v13 }
 0x394   :  { %936 = vmatprep.subr.bf16.mxu1 %v935_v15 }
 0x395   :  { %938 = vmatpush1.bf16.msra.mxu1 %v937_v18  ;;  %v797_v19 = vld [vmem:[#allocation2 + $0x48] sm:$0xf]  ;;  %v796_v10 = vld [vmem:[#allocation2 + $0x40] sm:$0xf] }
 0x396   :  { %904 = vmatprep.subr.msk.mxu1 %vm180_vm14, %v797_v19 }
 0x399   :  { %905 = vmatpush1.msk.msra.mxu1 %vm180_vm14, %v796_v10 }
 0x39a   :  { %906 = vmatmul.mubr.msk.f32.vlgmr.msra.gmra.mrb[2].mxu1 %vm176_vm12, %v1386_v33 }
 0x39b   :  { %v383_v34 = vpop.permute.xlu0 %382 }
 0x39c   :  { %v461_v20 = vadd.f32 %v1417_v38, %v383_v34  ;;  %v463_v59 = vadd.f32 %v1419_v62, %v383_v34 }
 0x39e   :  { %vm465_vm3 = vcmp.gt.f32.partialorder %v461_v20, 0.0  ;;  %v467_v60 = vmul.f32 0.1, %v461_v20  ;;  %vm466_vm7 = vcmp.gt.f32.partialorder %v463_v59, 0.0  ;;  %v468_v21 = vmul.f32 0.1, %v463_v59 }
 0x3a0   :  { %v469_v22 = vsel %vm465_vm3, %v461_v20, %v467_v60  ;;  %v470_v23 = vsel %vm466_vm7, %v463_v59, %v468_v21 }
 0x3a1   :  { %v471_v24 = vadd.f32 %v469_v22, %v993_v0  ;;  %v472_v55 = vadd.f32 %v470_v23, %v1003_v1 }
 0x3a3   :  { %473 = vst [vmem:[%s1508_s5] sm:$0xf] %v471_v24  ;;  %474 = vst [vmem:[%s1508_s5 + $0x8] sm:$0xf] %v472_v55 }
 0x46d   :  { %v870_v33 = vpop.f32.mrb[2].mxu1 }
 0x46e   :  { %v871_v38 = vadd.f32 %v870_v33, %v383_v34  ;;  %v872_v62 = vpop.f32.mrb[3].mxu1 }
 0x46f   :  { %v873_v56 = vadd.f32 %v872_v62, %v383_v34 }
 0x470   :  { %vm875_vm11 = vcmp.gt.f32.partialorder %v871_v38, 0.0  ;;  %v877_v25 = vmul.f32 0.1, %v871_v38 }
 0x471   :  { %vm876_vm12 = vcmp.gt.f32.partialorder %v873_v56, 0.0  ;;  %v878_v26 = vmul.f32 0.1, %v873_v56 }
 0x472   :  { %v879_v27 = vsel %vm875_vm11, %v871_v38, %v877_v25 }
 0x473   :  { %v881_v0 = vadd.f32 %v879_v27, %v1047_v8  ;;  %v880_v1 = vsel %vm876_vm12, %v873_v56, %v878_v26 }
 0x474   :  { %v882_v28 = vadd.f32 %v880_v1, %v1033_v3 }
 0x475   :  { %v885_v29 = vrot.slane %v881_v0, 4 }
 0x476   :  { %v886_v31 = vrot.slane %v882_v28, 4 }
 0x477   :  { %889 = vst [vmem:[%s1508_s5] sm:$0xf0] %v885_v29 }
 0x478   :  { %890 = vst [vmem:[%s1508_s5 + $0x8] sm:$0xf0] %v886_v31 }

</bundles_post_ra>
